<compile_context>
chip_gen: v5e
topology: v5e:2x2
jax: 0.10.0
libtpu: 0.0.40
codegen_flags: <defaults>
</compile_context>

<pallas_src>
import jax
import jax.numpy as jnp
from jax.experimental import pallas as pl
from jax.experimental.pallas import tpu as pltpu


def _round_up(a, b):
    return (a + b - 1) // b * b


def mlp_kernel(x_ref, w_fc_ref, b_fc_ref, w_proj_ref, b_proj_ref, o_ref, acc_ref):
    # x_ref:      (tm, nx)
    # w_fc_ref:   (nx, tk)        b_fc_ref:   (1, tk)
    # w_proj_ref: (tk, nx)        b_proj_ref: (1, nx)
    # o_ref:      (tm, nx)        acc_ref:    (tm, nx) f32 scratch
    k = pl.program_id(1)

    @pl.when(k == 0)
    def _():
        acc_ref[...] = jnp.zeros_like(acc_ref)

    x = x_ref[...].astype(w_fc_ref.dtype)

    # c_fc slab: (tm, nx) @ (nx, tk) -> (tm, tk), f32 accumulation on the MXU.
    h = jnp.dot(x, w_fc_ref[...], preferred_element_type=jnp.float32)
    h = jnp.maximum(h + b_fc_ref[...].astype(jnp.float32), 0.0)  # LeakyReLU(0) == ReLU

    # c_proj slab: (tm, tk) @ (tk, nx), accumulated over hidden slabs in f32.
    acc_ref[...] += jnp.dot(h.astype(w_proj_ref.dtype), w_proj_ref[...],
                            preferred_element_type=jnp.float32)

    @pl.when(k == pl.num_programs(1) - 1)
    def _():
        o_ref[...] = (acc_ref[...] + b_proj_ref[...].astype(jnp.float32)).astype(o_ref.dtype)


def mlp_forward(x, w_fc, b_fc, w_proj, b_proj, *, tm=256, tk=None, compute_dtype=None):
    """x: [B, T, nx]. w_fc: [nx, n_state], w_proj: [n_state, nx]. Returns [B, T, nx].

    compute_dtype: e.g. jnp.bfloat16 to feed the MXU bf16 inputs (f32 accumulation).
    """
    B, T, nx = x.shape
    n_state = w_fc.shape[1]
    out_dtype = x.dtype
    M = B * T

    if compute_dtype is not None:
        w_fc = w_fc.astype(compute_dtype)
        w_proj = w_proj.astype(compute_dtype)
        x2d = x.reshape(M, nx).astype(compute_dtype)
    else:
        x2d = x.reshape(M, nx)
    param_dtype = w_fc.dtype
    p_item = jnp.dtype(param_dtype).itemsize
    x_item = jnp.dtype(x2d.dtype).itemsize
    o_item = jnp.dtype(out_dtype).itemsize

    # --- row tiling: big tiles keep the MXU full; pad M up to a tile multiple ---
    tm = _round_up(max(tm, 8), 8)
    tm_eff = min(tm, _round_up(M, 8))
    M_pad = _round_up(M, tm_eff)
    if M_pad != M:
        x2d = jnp.pad(x2d, ((0, M_pad - M), (0, 0)))

    # --- hidden (n_state) tiling: keep double-buffered weight slabs well inside
    #     VMEM (v7x has only 64 MiB per TensorCore). tk must divide n_state and
    #     be lane-dense (multiple of 128) when smaller than n_state. ---
    if tk is None:
        tk = n_state
        weight_slab_budget = 16 * 1024 * 1024  # fc + proj slabs, double-buffered
        while (2 * 2 * nx * tk * p_item > weight_slab_budget
               and tk % 2 == 0 and (tk // 2) % 128 == 0):
            tk //= 2
    assert n_state % tk == 0 and (tk == n_state or tk % 128 == 0)

    b_fc2d = b_fc.reshape(1, n_state)
    b_proj2d = b_proj.reshape(1, nx)

    # --- scoped VMEM: cover double-buffered tiles + weight slabs + f32 scratch ---
    vmem_needed = (
        2 * tm_eff * nx * x_item          # activation tiles (double-buffered)
        + 2 * tm_eff * nx * o_item        # output tiles (double-buffered)
        + 2 * 2 * nx * tk * p_item        # fc + proj weight slabs (double-buffered)
        + 2 * (tk + nx) * p_item          # biases
        + tm_eff * nx * 4                 # f32 accumulator scratch
        + 2 * tm_eff * tk * 4             # f32 hidden intermediate + headroom
    )
    vmem_limit = int(min(max(vmem_needed * 3 // 2 + (2 << 20), 32 << 20), 64 << 20))

    cost = pl.CostEstimate(
        flops=4 * M * nx * n_state,       # two matmuls: 2*M*nx*n_state each
        transcendentals=0,
        bytes_accessed=(M * nx * (x_item + o_item)
                        + (2 * nx * n_state + n_state + nx) * p_item),
    )

    grid = (M_pad // tm_eff, n_state // tk)

    out2d = pl.pallas_call(
        mlp_kernel,
        out_shape=jax.ShapeDtypeStruct((M_pad, nx), out_dtype),
        grid_spec=pltpu.PrefetchScalarGridSpec(
            num_scalar_prefetch=0,
            grid=grid,
            in_specs=[
                # activations: tiled over rows, resident across the hidden axis
                pl.BlockSpec((tm_eff, nx), lambda i, k: (i, 0)),
                # weight / bias slabs: tiled over the hidden (n_state) axis
                pl.BlockSpec((nx, tk), lambda i, k: (0, k)),
                pl.BlockSpec((1, tk), lambda i, k: (0, k)),
                pl.BlockSpec((tk, nx), lambda i, k: (k, 0)),
                pl.BlockSpec((1, nx), lambda i, k: (0, 0)),
            ],
            # same output block across k -> accumulator stays resident
            out_specs=pl.BlockSpec((tm_eff, nx), lambda i, k: (i, 0)),
            scratch_shapes=[pltpu.VMEM((tm_eff, nx), jnp.float32)],
        ),
        compiler_params=pltpu.CompilerParams(
            dimension_semantics=("parallel", "arbitrary"),
            vmem_limit_bytes=vmem_limit,
        ),
        cost_estimate=cost,
    )(x2d, w_fc, b_fc2d, w_proj, b_proj2d)

    if M_pad != M:
        out2d = out2d[:M]
    return out2d.reshape(B, T, nx)


if __name__ == "__main__":
    # Small config consistent with the module: n_embd=128, n_state=4*n_embd=512.
    # (Lane-dense nx >= 128 keeps output stores unmasked; real GPT-2 widths are too.)
    B, T = 4, 128
    nx = 128        # config.n_embd
    n_state = 512   # n_state argument to MLP

    key = jax.random.PRNGKey(0)
    k_x, k_wfc, k_wproj = jax.random.split(key, 3)

    # Conv1D.__init__ semantics: weight ~ Normal(0, 0.02) of shape (nx_in, nf),
    # bias = zeros(nf).
    x = jax.random.normal(k_x, (B, T, nx), dtype=jnp.float32)
    w_fc = 0.02 * jax.random.normal(k_wfc, (nx, n_state), dtype=jnp.float32)
    b_fc = jnp.zeros((n_state,), dtype=jnp.float32)
    w_proj = 0.02 * jax.random.normal(k_wproj, (n_state, nx), dtype=jnp.float32)
    b_proj = jnp.zeros((nx,), dtype=jnp.float32)

    # Plain-JAX reference (same math).
    h_ref = jnp.maximum(x.reshape(-1, nx) @ w_fc + b_fc, 0.0)
    ref = (h_ref @ w_proj + b_proj).reshape(B, T, nx)

    # f32 compute path.
    out = jax.block_until_ready(mlp_forward(x, w_fc, b_fc, w_proj, b_proj))
    assert out.shape == ref.shape
    assert jnp.allclose(out, ref, atol=1e-3, rtol=1e-2), "f32 path mismatch vs reference"

    # bf16 MXU-input path (f32 accumulation) — looser tolerance.
    out_bf16 = jax.block_until_ready(
        mlp_forward(x, w_fc, b_fc, w_proj, b_proj, compute_dtype=jnp.bfloat16))
    assert jnp.allclose(out_bf16, ref, atol=1e-2, rtol=1e-1), "bf16 path mismatch vs reference"

    print("KERNEL_OK")
</pallas_src>

<mosaic_0001>
module attributes {stable_mosaic.version = 11 : i64} {
  func.func @mlp_kernel(%arg0: i32, %arg1: i32, %arg2: memref<256x128xf32, #tpu.memory_space<vmem>>, %arg3: memref<128x512xf32, #tpu.memory_space<vmem>>, %arg4: memref<1x512xf32, #tpu.memory_space<vmem>>, %arg5: memref<512x128xf32, #tpu.memory_space<vmem>>, %arg6: memref<1x128xf32, #tpu.memory_space<vmem>>, %arg7: memref<256x128xf32, #tpu.memory_space<vmem>>, %arg8: memref<256x128xf32, #tpu.memory_space<vmem>>) attributes {dimension_semantics = [#tpu.dimension_semantics<parallel>, #tpu.dimension_semantics<arbitrary>], iteration_bounds = array<i64: 2, 1>, scalar_prefetch = 0 : i64, scratch_operands = 1 : i64, tpu.core_type = #tpu.core_type<tc>, window_params = [{transform_indices = @transform_0, window_bounds = array<i64: 256, 128>}, {transform_indices = @transform_1, window_bounds = array<i64: 128, 512>}, {transform_indices = @transform_2, window_bounds = array<i64: 1, 512>}, {transform_indices = @transform_3, window_bounds = array<i64: 512, 128>}, {pipeline_mode = #tpu.pipeline_mode<synchronous>, transform_indices = @transform_4, window_bounds = array<i64: 1, 128>}, {transform_indices = @transform_5, window_bounds = array<i64: 256, 128>}]} {
    %c0_i32 = arith.constant 0 : i32
    %0 = arith.cmpi eq, %arg1, %c0_i32 : i32
    %1 = arith.extui %0 : i1 to i32
    %c0_i32_0 = arith.constant 0 : i32
    %2 = arith.cmpi ne, %1, %c0_i32_0 : i32
    scf.if %2 {
      %cst_16 = arith.constant 0.000000e+00 : f32
      %19 = vector.broadcast %cst_16 : f32 to vector<256x128xf32>
      %c0_17 = arith.constant 0 : index
      %c0_18 = arith.constant 0 : index
      %20 = vector.load %arg8[%c0_17, %c0_18] : memref<256x128xf32, #tpu.memory_space<vmem>>, vector<256x128xf32>
      tpu.vector_store %arg8[%c0_17, %c0_18], %19 {strides = array<i32>} : memref<256x128xf32, #tpu.memory_space<vmem>>, vector<256x128xf32>,
    } else {
    }
    %c0 = arith.constant 0 : index
    %c0_1 = arith.constant 0 : index
    %3 = vector.load %arg2[%c0, %c0_1] : memref<256x128xf32, #tpu.memory_space<vmem>>, vector<256x128xf32>
    %c0_2 = arith.constant 0 : index
    %c0_3 = arith.constant 0 : index
    %4 = vector.load %arg3[%c0_2, %c0_3] : memref<128x512xf32, #tpu.memory_space<vmem>>, vector<128x512xf32>
    %cst = arith.constant dense<0.000000e+00> : vector<256x512xf32>
    %5 = tpu.matmul %3, %4, %cst {dimension_numbers = #tpu.dot_dimension_numbers<[1], [0], [0], [1], [0, 0, 1, 1], [], []>} : vector<256x128xf32>, vector<128x512xf32>, vector<256x512xf32> -> vector<256x512xf32>
    %c0_4 = arith.constant 0 : index
    %c0_5 = arith.constant 0 : index
    %6 = vector.load %arg4[%c0_4, %c0_5] : memref<1x512xf32, #tpu.memory_space<vmem>>, vector<1x512xf32>
    %7 = vector.broadcast %6 : vector<1x512xf32> to vector<256x512xf32>
    %8 = arith.addf %5, %7 : vector<256x512xf32>
    %cst_6 = arith.constant 0.000000e+00 : f32
    %9 = vector.broadcast %cst_6 : f32 to vector<256x512xf32>
    %10 = arith.maximumf %8, %9 : vector<256x512xf32>
    %c0_7 = arith.constant 0 : index
    %c0_8 = arith.constant 0 : index
    %11 = vector.load %arg8[%c0_7, %c0_8] : memref<256x128xf32, #tpu.memory_space<vmem>>, vector<256x128xf32>
    %c0_9 = arith.constant 0 : index
    %c0_10 = arith.constant 0 : index
    %12 = vector.load %arg5[%c0_9, %c0_10] : memref<512x128xf32, #tpu.memory_space<vmem>>, vector<512x128xf32>
    %cst_11 = arith.constant dense<0.000000e+00> : vector<256x128xf32>
    %13 = tpu.matmul %10, %12, %cst_11 {dimension_numbers = #tpu.dot_dimension_numbers<[1], [0], [0], [1], [0, 0, 1, 1], [], []>} : vector<256x512xf32>, vector<512x128xf32>, vector<256x128xf32> -> vector<256x128xf32>
    %14 = arith.addf %11, %13 : vector<256x128xf32>
    %c0_12 = arith.constant 0 : index
    %c0_13 = arith.constant 0 : index
    %15 = vector.load %arg8[%c0_12, %c0_13] : memref<256x128xf32, #tpu.memory_space<vmem>>, vector<256x128xf32>
    tpu.vector_store %arg8[%c0_12, %c0_13], %14 {strides = array<i32>} : memref<256x128xf32, #tpu.memory_space<vmem>>, vector<256x128xf32>,
    %c0_i32_14 = arith.constant 0 : i32
    %16 = arith.cmpi eq, %arg1, %c0_i32_14 : i32
    %17 = arith.extui %16 : i1 to i32
    %c0_i32_15 = arith.constant 0 : i32
    %18 = arith.cmpi ne, %17, %c0_i32_15 : i32
    scf.if %18 {
      %c0_16 = arith.constant 0 : index
      %c0_17 = arith.constant 0 : index
      %19 = vector.load %arg8[%c0_16, %c0_17] : memref<256x128xf32, #tpu.memory_space<vmem>>, vector<256x128xf32>
      %c0_18 = arith.constant 0 : index
      %c0_19 = arith.constant 0 : index
      %20 = vector.load %arg6[%c0_18, %c0_19] : memref<1x128xf32, #tpu.memory_space<vmem>>, vector<1x128xf32>
      %21 = vector.broadcast %20 : vector<1x128xf32> to vector<256x128xf32>
      %22 = arith.addf %19, %21 : vector<256x128xf32>
      %c0_20 = arith.constant 0 : index
      %c0_21 = arith.constant 0 : index
      %23 = vector.load %arg7[%c0_20, %c0_21] : memref<256x128xf32, #tpu.memory_space<vmem>>, vector<256x128xf32>
      tpu.vector_store %arg7[%c0_20, %c0_21], %22 {strides = array<i32>} : memref<256x128xf32, #tpu.memory_space<vmem>>, vector<256x128xf32>,
    } else {
    }
    return
  }
  func.func @transform_0(%arg0: i32, %arg1: i32) -> (i32, i32) {
    %c0_i32 = arith.constant 0 : i32
    %c0_i32_0 = arith.constant 0 : i32
    return %arg0, %c0_i32 : i32, i32
  }
  func.func @transform_1(%arg0: i32, %arg1: i32) -> (i32, i32) {
    %c0_i32 = arith.constant 0 : i32
    %c0_i32_0 = arith.constant 0 : i32
    return %c0_i32, %arg1 : i32, i32
  }
  func.func @transform_2(%arg0: i32, %arg1: i32) -> (i32, i32) {
    %c0_i32 = arith.constant 0 : i32
    %c0_i32_0 = arith.constant 0 : i32
    return %c0_i32, %arg1 : i32, i32
  }
  func.func @transform_3(%arg0: i32, %arg1: i32) -> (i32, i32) {
    %c0_i32 = arith.constant 0 : i32
    %c0_i32_0 = arith.constant 0 : i32
    return %arg1, %c0_i32 : i32, i32
  }
  func.func @transform_4(%arg0: i32, %arg1: i32) -> (i32, i32) {
    %c0_i32 = arith.constant 0 : i32
    %c0_i32_0 = arith.constant 0 : i32
    %c0_i32_1 = arith.constant 0 : i32
    return %c0_i32, %c0_i32_0 : i32, i32
  }
  func.func @transform_5(%arg0: i32, %arg1: i32) -> (i32, i32) {
    %c0_i32 = arith.constant 0 : i32
    %c0_i32_0 = arith.constant 0 : i32
    return %arg0, %c0_i32 : i32, i32
  }
}

</mosaic_0001>

<bundles_post_ra>
// kernel: tpu_custom_call.1
= control target key start
LH: loop header
LB: loop body
LE: loop exit
PB: predicated region body
PF: predicated region fallthrough
CT: control target
= control target key end

     0   :  { %s3083_s0 = inlined_call_operand.hbm [shape: f32[512,128], index: 0, kind: input, shape index: {}]   ;;  %s3084_s1 = inlined_call_operand.hbm [shape: f32[128,512], index: 1, kind: input, shape index: {}]   ;;  %s3085_s2 = inlined_call_operand.hbm [shape: f32[1,512], index: 2, kind: input, shape index: {}]   ;;  %s3086_s3 = inlined_call_operand.hbm [shape: f32[512,128], index: 3, kind: input, shape index: {}]   ;;  %s3087_s4 = inlined_call_operand.vmem [shape: f32[1,128], index: 4, kind: input, shape index: {}]   ;;  %s3088_s5 = inlined_call_operand.hbm [shape: f32[512,128], index: 5, kind: output, shape index: {}]  }
   0x1   :  { %3091 = sst [smem:[#allocation34_spill]] %s3084_s1 }
   0x2   :  { %3092 = sst [smem:[#allocation35_spill]] %s3085_s2 }
   0x3   :  { %3093 = sst [smem:[#allocation36_spill]] %s3086_s3 }
   0x4   :  { %10 = vsyncpa [#allocation4], 0 }
   0x5   :  { %12 = vsyncpa [#allocation4 + $0x1], 0 }
   0x6   :  { %13 = vsyncpa [#allocation7], 0 }
   0x7   :  { %14 = vsyncpa [#allocation10], 0 }
   0x8   :  { %15 = vsyncpa [#allocation5], 0 }
   0x9   :  { %17 = vsyncpa [#allocation5 + $0x1], 0  ;;  %s2276_s18 = smov 0   ;;  %s2278_s19 = smov 0  }
   0xa   :  { %s2280_s20 = smov 0   ;;  %s2282_s21 = smov 0  }
   0xb   :  { %s2284_s22 = smov 0   ;;  %s2286_s23 = smov 0  }
   0xc LB: > { %s1902_s24 = sadd.s32 4294967295, %s2235_s23   ;;  %s1903_s25 = sadd.s32 4294967294, %s2235_s23   ;;  %s2235_s23 = sphi %s2286_s23, %s23_s23   ;;  %s2231_s22 = sphi %s2284_s22, %s3169_s22   ;;  %s2227_s21 = sphi %s2282_s21, %s3168_s21   ;;  %s2223_s20 = sphi %s2280_s20, %s3167_s20   ;;  %s2219_s19 = sphi %s2278_s19, %s3166_s19   ;;  %s2215_s18 = sphi %s2276_s18, %s3165_s18  }
   0xd   : > { %p55_p0 = scmp.ne.s32.totalorder %s2219_s19, %s2215_s18  ;;  %p2310_p1 = scmp.eq.s32.totalorder %s1902_s24, 0 }
   0xe   : > { %p2314_p2 = scmp.eq.s32.totalorder %s1902_s24, 1  ;;  %p184_p3 = scmp.eq.s32.totalorder %s1903_s25, 1 }
   0xf   : > { %p2320_p4 = por %p2310_p1, %p55_p0  ;;  %p1904_p5 = scmp.ge.s32.totalorder %s2235_s23, 1 }
  0x10   : > { %p2325_p6 = por %p184_p3, %p55_p0  ;;  %p191_p7 = scmp.lt.s32.totalorder %s2235_s23, 3 }
  0x11   : > { %s3098_s1 = sld [smem:[#allocation34_spill]]  ;;  %s2237_s9 = smov [#allocation6]  }
  0x12   : > { %p2333_p8 = pnand %p1904_p5, %p191_p7  ;;  %s207_s10 = sshll.u32 %s2237_s9, 4  ;;  %s208_s10 = int_to_ptr.vmem [resolvable:$true] %s207_s10 }
  0x13   : > { %p1908_p11 = scmp.ge.s32.totalorder %s2235_s23, 2  ;;  %s3101_s2 = sld [smem:[#allocation35_spill]] }
  0x14   : > { %p1941_p9 = pneg %p2333_p8  ;;  %s2238_s15 = smov 512  }
  0x15   : > { %s2239_s16 = smov 32   ;;  %s2240_s17 = smov [#allocation8]  }
  0x16   : > { %p2341_p10 = pnand %p1941_p9, %p2310_p1  ;;  %s224_s24 = sshll.u32 %s2240_s17, 4  ;;  %s225_s24 = int_to_ptr.vmem [resolvable:$true] %s224_s24 }
  0x17   : > { %s205_s7 = sshll.u32 %s3098_s1, 4  ;;  %s3102_s3 = sld [smem:[#allocation36_spill]]  ;;  %s206_s7 = int_to_ptr.hbm [resolvable:$true] %s205_s7 }
  0x18   : > { %1944 = dma.hbm_to_vmem [thread:$0]  (!%p2341_p10), %s206_s7, 8192, %s208_s10, [#allocation7], %s2238_s15, %s2238_s15, %s2239_s16  }
  0x19   : > { %s222_s14 = sshll.u32 %s3101_s2, 4  ;;  %s2241_s9 = smov [#allocation9]   ;;  %s223_s14 = int_to_ptr.hbm [resolvable:$true] %s222_s14 }
  0x1a   : > { %1947 = dma.hbm_to_vmem [thread:$0]  (!%p2341_p10), %s223_s14, 64, %s225_s24, [#allocation7]  }
  0x1b   : > { %s238_s12 = sshll.u32 %s2241_s9, 4  ;;  %s3089_s13 = smov 128   ;;  %s239_s12 = int_to_ptr.vmem [resolvable:$true] %s238_s12 }
  0x1c   : > { %s3090_s7 = smov 8   ;;  %s42_s10 = sadd.s32 1, %s2223_s20 }
  0x1d   : > { %s236_s6 = sshll.u32 %s3102_s3, 4  ;;  %s35_s15 = sadd.s32 1, %s2231_s22  ;;  %s237_s6 = int_to_ptr.hbm [resolvable:$true] %s236_s6 }
  0x1e   : > { %1950 = dma.hbm_to_vmem [thread:$0]  (!%p2341_p10), %s237_s6, 8192, %s239_s12, [#allocation10], %s3089_s13, %s3089_s13, %s3090_s7  }
  0x1f   : > { %p49_p12 = scmp.ne.s32.totalorder %s2223_s20, %s2219_s19  ;;  %p37_p13 = scmp.ge.s32.totalorder %s35_s15, 2 }
  0x20   : > { %p50_p0 = scmp.eq.s32.totalorder %s2235_s23, 0  ;;  %p1962_p5 = scmp.lt.s32.totalorder %s2235_s23, 2 }
  0x21   : > { %p2368_p3 = por %p2314_p2, %p49_p12  ;;  %s3171_s15 = smov (%p37_p13, %s35_s15), 0 }
  0x22   : > { %p2375_p7 = por %p50_p0, %p49_p12  ;;  %s255_s16 = sand.u32 1, %s2223_s20  }
  0x23   : > { %s39_s17 = ssub.s32 %s2231_s22, %s3171_s15  ;;  %s1909_s24 = sshll.u32 %s255_s16, 8 }
  0x24   : > { %p40_p9 = scmp.eq.s32.totalorder %s39_s17, 0  ;;  %s1923_s25 = sshll.u32 %s2231_s22, 8 }
  0x25   : > { %s264_s9 = scalar_lea.hbm %s3083_s0, %s1923_s25  ;;  %s259_s12 = scalar_lea.vmem [#allocation3], %s1909_s24 }
  0x26   : > { %s2384_s27 = scalar_select %p40_p9, %s2223_s20, %s42_s10  }
  0x27   : > { %s267_s13 = sshll.u32 %s259_s12, 4  ;;  %s265_s7 = sshll.u32 %s264_s9, 4  ;;  %s268_s13 = int_to_ptr.vmem [resolvable:$true] %s267_s13  ;;  %s266_s7 = int_to_ptr.hbm [resolvable:$true] %s265_s7 }
  0x28   : > { %p1952_p2 = pnand %p1962_p5, %p2375_p7  ;;  %s256_s1 = scalar_lea.sflag [#allocation4], %s255_s16 }
  0x29   : > { %s3105_s2 = smov 8   ;;  %s3106_s3 = smov 128  }
  0x2a   : > { %1954 = dma.hbm_to_vmem [thread:$0]  (!%p1952_p2), %s266_s7, 4096, %s268_s13, %s256_s1, %s3106_s3, %s3106_s3, %s3105_s2  }
  0x2b   : > { %279 = sbr.rel (%p2333_p8) target bundleno = 736 (0x2e0), region = 40 }
  0x30   : > { %s2399_s10 = sand.u32 1, %s2219_s19  }
  0x31   : > { %s1913_s17 = sshll.u32 %s2399_s10, 8  ;;  %s282_s24 = scalar_lea.sflag [#allocation4], %s2399_s10 }
  0x32   : > { %s2405_s11 = scalar_lea.vmem [#allocation3], %s1913_s17 }
  0x33   : > { %2198 = dma.done.wait (%p2320_p4), %s282_s24, 4096  }
  0x34   : > { %2200 = vsyncadd (%p2320_p4), %s282_s24, 4294963200 }
  0x35   : > { %2202 = dma.done.wait (%p2310_p1), [#allocation7], 8256  }
  0x36   : > { %2204 = vsyncadd (%p2310_p1), [#allocation7], 4294959040 }
  0x37   : > { %2206 = dma.done.wait (%p2310_p1), [#allocation10], 8192  }
  0x38   : > { %2208 = vsyncadd (%p2310_p1), [#allocation10], 4294959104  ;;  %v461_v0 = vld [vmem:[#allocation6 + $0x1e0] sm:$0xff]  ;;  %v462_v1 = vld [vmem:[#allocation6 + $0x1e8] sm:$0xff]  ;;  %s2875_s3 = scalar_lea.vmem [#allocation11], %s1913_s17  ;;  %s1924_s26 = sshll.u32 %s2227_s21, 8 }
  0x39   : > { %v463_v2 = vld [vmem:[#allocation6 + $0x1f0] sm:$0xff]  ;;  %475 = vmatpush.msra.mxu0 %v461_v0  ;;  %588 = vmatpush.msra.mxu1 %v462_v1  ;;  %v464_v3 = vld [vmem:[#allocation6 + $0x1f8] sm:$0xff]  ;;  %v457_v4 = vld [vmem:[#allocation6 + $0x1c0] sm:$0xff]  ;;  %s1782_s13 = scalar_lea.hbm %s3088_s5, %s1924_s26  ;;  %s1783_s7 = sshll.u32 %s2875_s3, 4  ;;  %s1784_s7 = int_to_ptr.vmem [resolvable:$true] %s1783_s7 }
  0x3a   : > { %v458_v5 = vld [vmem:[#allocation6 + $0x1c8] sm:$0xff]  ;;  %701 = vmatpush.msra.mxu2 %v463_v2  ;;  %814 = vmatpush.msra.mxu3 %v464_v3  ;;  %v459_v6 = vld [vmem:[#allocation6 + $0x1d0] sm:$0xff]  ;;  %v460_v7 = vld [vmem:[#allocation6 + $0x1d8] sm:$0xff]  ;;  %s1785_s16 = sshll.u32 %s1782_s13, 4  ;;  %s1771_s21 = scalar_lea.sflag [#allocation5], %s2399_s10  ;;  %s1786_s16 = int_to_ptr.hbm [resolvable:$true] %s1785_s16 }
  0x3b   : > { %v453_v8 = vld [vmem:[#allocation6 + $0x1a0] sm:$0xff]  ;;  %476 = vmatpush.msra.mxu0 %v457_v4  ;;  %589 = vmatpush.msra.mxu1 %v458_v5  ;;  %v454_v9 = vld [vmem:[#allocation6 + $0x1a8] sm:$0xff]  ;;  %v455_v10 = vld [vmem:[#allocation6 + $0x1b0] sm:$0xff]  ;;  %s2159_s25 = sshra.s32 %s1786_s16, 4  ;;  %s2165_s12 = scalar_lea.hbm %s3088_s5, 512  ;;  %s2160_s25 = int_to_ptr.hbm [resolvable:$true] %s2159_s25 }
  0x3c   : > { %v456_v11 = vld [vmem:[#allocation6 + $0x1b8] sm:$0xff]  ;;  %702 = vmatpush.msra.mxu2 %v459_v6  ;;  %815 = vmatpush.msra.mxu3 %v460_v7  ;;  %v449_v12 = vld [vmem:[#allocation6 + $0x180] sm:$0xff]  ;;  %v450_v13 = vld [vmem:[#allocation6 + $0x188] sm:$0xff]  ;;  %s2161_s30 = scalar_lea.hbm %s2160_s25, 256  ;;  %p2166_p10 = scmp.lt.s32.totalorder %s2160_s25, %s3088_s5 }
  0x3d   : > { %477 = vmatpush.msra.mxu0 %v453_v8  ;;  %590 = vmatpush.msra.mxu1 %v454_v9  ;;  %v451_v14 = vld [vmem:[#allocation6 + $0x190] sm:$0xff]  ;;  %v452_v15 = vld [vmem:[#allocation6 + $0x198] sm:$0xff]  ;;  %v445_v16 = vld [vmem:[#allocation6 + $0x160] sm:$0xff]  ;;  %p2162_p1 = scmp.ne.s32.totalorder %s2160_s25, %s2161_s30  ;;  %p2167_p12 = scmp.lt.s32.totalorder %s2165_s12, %s2161_s30 }
  0x3e   : > { %703 = vmatpush.msra.mxu2 %v455_v10  ;;  %816 = vmatpush.msra.mxu3 %v456_v11  ;;  %v446_v17 = vld [vmem:[#allocation6 + $0x168] sm:$0xff]  ;;  %v447_v18 = vld [vmem:[#allocation6 + $0x170] sm:$0xff]  ;;  %v448_v19 = vld [vmem:[#allocation6 + $0x178] sm:$0xff] }
  0x3f   : > { %478 = vmatpush.msra.mxu0 %v449_v12  ;;  %591 = vmatpush.msra.mxu1 %v450_v13  ;;  %v441_v20 = vld [vmem:[#allocation6 + $0x140] sm:$0xff]  ;;  %v442_v21 = vld [vmem:[#allocation6 + $0x148] sm:$0xff]  ;;  %v443_v22 = vld [vmem:[#allocation6 + $0x150] sm:$0xff]  ;;  %p2163_p4 = pnand %p2162_p1, %p2368_p3  ;;  %p2168_p13 = por %p2167_p12, %p2166_p10 }
  0x40   : > { %704 = vmatpush.msra.mxu2 %v451_v14  ;;  %817 = vmatpush.msra.mxu3 %v452_v15  ;;  %v444_v23 = vld [vmem:[#allocation6 + $0x158] sm:$0xff]  ;;  %v437_v24 = vld [vmem:[#allocation6 + $0x120] sm:$0xff]  ;;  %v438_v25 = vld [vmem:[#allocation6 + $0x128] sm:$0xff] }
  0x41   : > { %479 = vmatpush.msra.mxu0 %v445_v16  ;;  %592 = vmatpush.msra.mxu1 %v446_v17  ;;  %v439_v26 = vld [vmem:[#allocation6 + $0x130] sm:$0xff]  ;;  %v440_v27 = vld [vmem:[#allocation6 + $0x138] sm:$0xff]  ;;  %v433_v28 = vld [vmem:[#allocation6 + $0x100] sm:$0xff]  ;;  %p2164_p8 = pneg %p2163_p4 }
  0x42   : > { %705 = vmatpush.msra.mxu2 %v447_v18  ;;  %818 = vmatpush.msra.mxu3 %v448_v19  ;;  %v434_v29 = vld [vmem:[#allocation6 + $0x108] sm:$0xff]  ;;  %v435_v30 = vld [vmem:[#allocation6 + $0x110] sm:$0xff]  ;;  %v436_v31 = vld [vmem:[#allocation6 + $0x118] sm:$0xff] }
  0x43   : > { %480 = vmatpush.msra.mxu0 %v441_v20  ;;  %593 = vmatpush.msra.mxu1 %v442_v21  ;;  %v429_v32 = vld [vmem:[#allocation6 + $0xe0] sm:$0xff]  ;;  %v430_v33 = vld [vmem:[#allocation6 + $0xe8] sm:$0xff]  ;;  %v431_v34 = vld [vmem:[#allocation6 + $0xf0] sm:$0xff]  ;;  %p2169_p0 = pnand %p2168_p13, %p2164_p8 }
  0x44   : > { %706 = vmatpush.msra.mxu2 %v443_v22  ;;  %819 = vmatpush.msra.mxu3 %v444_v23  ;;  %v432_v35 = vld [vmem:[#allocation6 + $0xf8] sm:$0xff]  ;;  %v425_v36 = vld [vmem:[#allocation6 + $0xc0] sm:$0xff]  ;;  %v426_v37 = vld [vmem:[#allocation6 + $0xc8] sm:$0xff] }
  0x45   : > { %481 = vmatpush.msra.mxu0 %v437_v24  ;;  %594 = vmatpush.msra.mxu1 %v438_v25  ;;  %v427_v38 = vld [vmem:[#allocation6 + $0xd0] sm:$0xff]  ;;  %v428_v39 = vld [vmem:[#allocation6 + $0xd8] sm:$0xff]  ;;  %v421_v40 = vld [vmem:[#allocation6 + $0xa0] sm:$0xff] }
  0x46   : > { %707 = vmatpush.msra.mxu2 %v439_v26  ;;  %820 = vmatpush.msra.mxu3 %v440_v27  ;;  %v422_v41 = vld [vmem:[#allocation6 + $0xa8] sm:$0xff]  ;;  %v423_v42 = vld [vmem:[#allocation6 + $0xb0] sm:$0xff]  ;;  %v424_v43 = vld [vmem:[#allocation6 + $0xb8] sm:$0xff] }
  0x47   : > { %482 = vmatpush.msra.mxu0 %v433_v28  ;;  %595 = vmatpush.msra.mxu1 %v434_v29  ;;  %v417_v44 = vld [vmem:[#allocation6 + $0x80] sm:$0xff]  ;;  %v418_v45 = vld [vmem:[#allocation6 + $0x88] sm:$0xff]  ;;  %v419_v46 = vld [vmem:[#allocation6 + $0x90] sm:$0xff] }
  0x48   : > { %708 = vmatpush.msra.mxu2 %v435_v30  ;;  %821 = vmatpush.msra.mxu3 %v436_v31  ;;  %v420_v47 = vld [vmem:[#allocation6 + $0x98] sm:$0xff]  ;;  %v413_v48 = vld [vmem:[#allocation6 + $0x60] sm:$0xff]  ;;  %v414_v49 = vld [vmem:[#allocation6 + $0x68] sm:$0xff] }
  0x49   : > { %483 = vmatpush.msra.mxu0 %v429_v32  ;;  %596 = vmatpush.msra.mxu1 %v430_v33  ;;  %v415_v50 = vld [vmem:[#allocation6 + $0x70] sm:$0xff]  ;;  %v416_v51 = vld [vmem:[#allocation6 + $0x78] sm:$0xff]  ;;  %v409_v52 = vld [vmem:[#allocation6 + $0x40] sm:$0xff] }
  0x4a   : > { %709 = vmatpush.msra.mxu2 %v431_v34  ;;  %822 = vmatpush.msra.mxu3 %v432_v35  ;;  %v410_v53 = vld [vmem:[#allocation6 + $0x48] sm:$0xff]  ;;  %v411_v54 = vld [vmem:[#allocation6 + $0x50] sm:$0xff]  ;;  %v412_v55 = vld [vmem:[#allocation6 + $0x58] sm:$0xff] }
  0x4b   : > { %484 = vmatpush.msra.mxu0 %v425_v36  ;;  %597 = vmatpush.msra.mxu1 %v426_v37  ;;  %v405_v56 = vld [vmem:[#allocation6 + $0x20] sm:$0xff]  ;;  %v406_v57 = vld [vmem:[#allocation6 + $0x28] sm:$0xff]  ;;  %v407_v58 = vld [vmem:[#allocation6 + $0x30] sm:$0xff] }
  0x4c   : > { %710 = vmatpush.msra.mxu2 %v427_v38  ;;  %823 = vmatpush.msra.mxu3 %v428_v39  ;;  %v408_v59 = vld [vmem:[#allocation6 + $0x38] sm:$0xff]  ;;  %v401_v60 = vld [vmem:[#allocation6] sm:$0xff]  ;;  %v402_v61 = vld [vmem:[#allocation6 + $0x8] sm:$0xff] }
  0x4d   : > { %485 = vmatpush.msra.mxu0 %v421_v40  ;;  %598 = vmatpush.msra.mxu1 %v422_v41  ;;  %v403_v62 = vld [vmem:[#allocation6 + $0x10] sm:$0xff]  ;;  %v404_v63 = vld [vmem:[#allocation6 + $0x18] sm:$0xff]  ;;  %v369_v0 = vld [vmem:[%s2405_s11] sm:$0xff] }
  0x4e   : > { %711 = vmatpush.msra.mxu2 %v423_v42  ;;  %824 = vmatpush.msra.mxu3 %v424_v43  ;;  %v1134_v1 = vld [vmem:[#allocation9 + $0x178] sm:$0xff]  ;;  %v1133_v5 = vld [vmem:[#allocation9 + $0x170] sm:$0xff]  ;;  %v1132_v9 = vld [vmem:[#allocation9 + $0x168] sm:$0xff] }
  0x4f   : > { %486 = vmatpush.msra.mxu0 %v417_v44  ;;  %599 = vmatpush.msra.mxu1 %v418_v45  ;;  %v1150_v2 = vld [vmem:[#allocation9 + $0x1f8] sm:$0xff]  ;;  %v1149_v6 = vld [vmem:[#allocation9 + $0x1f0] sm:$0xff]  ;;  %v1148_v10 = vld [vmem:[#allocation9 + $0x1e8] sm:$0xff] }
  0x50   : > { %712 = vmatpush.msra.mxu2 %v419_v46  ;;  %825 = vmatpush.msra.mxu3 %v420_v47  ;;  %v1102_v3 = vld [vmem:[#allocation9 + $0x78] sm:$0xff]  ;;  %v1101_v7 = vld [vmem:[#allocation9 + $0x70] sm:$0xff]  ;;  %v1100_v11 = vld [vmem:[#allocation9 + $0x68] sm:$0xff] }
  0x51   : > { %487 = vmatpush.msra.mxu0 %v413_v48  ;;  %600 = vmatpush.msra.mxu1 %v414_v49  ;;  %v1118_v4 = vld [vmem:[#allocation9 + $0xf8] sm:$0xff]  ;;  %v1117_v8 = vld [vmem:[#allocation9 + $0xf0] sm:$0xff]  ;;  %v1116_v12 = vld [vmem:[#allocation9 + $0xe8] sm:$0xff] }
  0x52   : > { %713 = vmatpush.msra.mxu2 %v415_v50  ;;  %826 = vmatpush.msra.mxu3 %v416_v51  ;;  %v370_v13 = vld [vmem:[%s2405_s11 + $0x8] sm:$0xff]  ;;  %v371_v14 = vld [vmem:[%s2405_s11 + $0x10] sm:$0xff]  ;;  %v372_v19 = vld [vmem:[%s2405_s11 + $0x18] sm:$0xff] }
  0x53   : > { %488 = vmatpush.msra.mxu0 %v409_v52  ;;  %601 = vmatpush.msra.mxu1 %v410_v53  ;;  %v1131_v15 = vld [vmem:[#allocation9 + $0x160] sm:$0xff]  ;;  %v1130_v21 = vld [vmem:[#allocation9 + $0x158] sm:$0xff]  ;;  %v375_v26 = vld [vmem:[%s2405_s11 + $0x30] sm:$0xff] }
  0x54   : > { %714 = vmatpush.msra.mxu2 %v411_v54  ;;  %827 = vmatpush.msra.mxu3 %v412_v55  ;;  %v1147_v16 = vld [vmem:[#allocation9 + $0x1e0] sm:$0xff]  ;;  %v1146_v22 = vld [vmem:[#allocation9 + $0x1d8] sm:$0xff]  ;;  %v1129_v27 = vld [vmem:[#allocation9 + $0x150] sm:$0xff] }
  0x55   : > { %489 = vmatpush.msra.mxu0 %v405_v56  ;;  %602 = vmatpush.msra.mxu1 %v406_v57  ;;  %v1099_v17 = vld [vmem:[#allocation9 + $0x60] sm:$0xff]  ;;  %v1098_v23 = vld [vmem:[#allocation9 + $0x58] sm:$0xff]  ;;  %v1145_v28 = vld [vmem:[#allocation9 + $0x1d0] sm:$0xff] }
  0x56   : > { %715 = vmatpush.msra.mxu2 %v407_v58  ;;  %828 = vmatpush.msra.mxu3 %v408_v59  ;;  %v1115_v18 = vld [vmem:[#allocation9 + $0xe0] sm:$0xff]  ;;  %v1114_v24 = vld [vmem:[#allocation9 + $0xd8] sm:$0xff]  ;;  %v1097_v29 = vld [vmem:[#allocation9 + $0x50] sm:$0xff] }
  0x57   : > { %490 = vmatpush.msra.mxu0 %v401_v60  ;;  %603 = vmatpush.msra.mxu1 %v402_v61  ;;  %v373_v20 = vld [vmem:[%s2405_s11 + $0x20] sm:$0xff]  ;;  %v374_v25 = vld [vmem:[%s2405_s11 + $0x28] sm:$0xff]  ;;  %v1113_v30 = vld [vmem:[#allocation9 + $0xd0] sm:$0xff] }
  0x58   : > { %716 = vmatpush.msra.mxu2 %v403_v62  ;;  %829 = vmatpush.msra.mxu3 %v404_v63  ;;  %v376_v31 = vld [vmem:[%s2405_s11 + $0x38] sm:$0xff]  ;;  %v377_v32 = vld [vmem:[%s2405_s11 + $0x40] sm:$0xff]  ;;  %v1128_v33 = vld [vmem:[#allocation9 + $0x148] sm:$0xff] }
  0x59   : > { %491 = vmatmul.f32.vlgmr.msra.gmra.mxu0 %v369_v0  ;;  %604 = vmatmul.f32.vlgmr.msra.gmra.mxu1 %v369_v0  ;;  %v1144_v34 = vld [vmem:[#allocation9 + $0x1c8] sm:$0xff]  ;;  %v1127_v39 = vld [vmem:[#allocation9 + $0x140] sm:$0xff]  ;;  %v380_v43 = vld [vmem:[%s2405_s11 + $0x58] sm:$0xff] }
  0x5a   : > { %717 = vmatmul.f32.vlgmr.msra.gmra.mxu2 %v369_v0  ;;  %830 = vmatmul.f32.vlgmr.msra.gmra.mxu3 %v369_v0  ;;  %v1096_v35 = vld [vmem:[#allocation9 + $0x48] sm:$0xff]  ;;  %v1143_v40 = vld [vmem:[#allocation9 + $0x1c0] sm:$0xff]  ;;  %v1126_v45 = vld [vmem:[#allocation9 + $0x138] sm:$0xff] }
  0x5b   : > { %1377 = vmatpush.msrb.mxu2 %v1134_v1  ;;  %1490 = vmatpush.msrb.mxu3 %v1150_v2  ;;  %v1112_v36 = vld [vmem:[#allocation9 + $0xc8] sm:$0xff]  ;;  %v1095_v41 = vld [vmem:[#allocation9 + $0x40] sm:$0xff]  ;;  %v1142_v46 = vld [vmem:[#allocation9 + $0x1b8] sm:$0xff] }
  0x5c   : > { %1151 = vmatpush.msrb.mxu0 %v1102_v3  ;;  %1264 = vmatpush.msrb.mxu1 %v1118_v4  ;;  %v378_v37 = vld [vmem:[%s2405_s11 + $0x48] sm:$0xff]  ;;  %v379_v38 = vld [vmem:[%s2405_s11 + $0x50] sm:$0xff]  ;;  %v381_v44 = vld [vmem:[%s2405_s11 + $0x60] sm:$0xff] }
  0x5d   : > { %1378 = vmatpush.msrb.mxu2 %v1133_v5  ;;  %1491 = vmatpush.msrb.mxu3 %v1149_v6  ;;  %v1111_v42 = vld [vmem:[#allocation9 + $0xc0] sm:$0xff]  ;;  %v1094_v48 = vld [vmem:[#allocation9 + $0x38] sm:$0xff]  ;;  %v383_v50 = vld [vmem:[%s2405_s11 + $0x70] sm:$0xff] }
  0x5e   : > { %1152 = vmatpush.msrb.mxu0 %v1101_v7  ;;  %1265 = vmatpush.msrb.mxu1 %v1117_v8  ;;  %v382_v47 = vld [vmem:[%s2405_s11 + $0x68] sm:$0xff]  ;;  %v1110_v49 = vld [vmem:[#allocation9 + $0xb8] sm:$0xff]  ;;  %v1125_v51 = vld [vmem:[#allocation9 + $0x130] sm:$0xff] }
  0x5f   : > { %1379 = vmatpush.msrb.mxu2 %v1132_v9  ;;  %1492 = vmatpush.msrb.mxu3 %v1148_v10  ;;  %v1141_v52 = vld [vmem:[#allocation9 + $0x1b0] sm:$0xff]  ;;  %v385_v58 = vld [vmem:[%s2405_s11 + $0x80] sm:$0xff]  ;;  %v1124_v59 = vld [vmem:[#allocation9 + $0x128] sm:$0xff] }
  0x60   : > { %1153 = vmatpush.msrb.mxu0 %v1100_v11  ;;  %1266 = vmatpush.msrb.mxu1 %v1116_v12  ;;  %v384_v53 = vld [vmem:[%s2405_s11 + $0x78] sm:$0xff]  ;;  %v1140_v60 = vld [vmem:[#allocation9 + $0x1a8] sm:$0xff]  ;;  %v1123_v9 = vld [vmem:[#allocation9 + $0x120] sm:$0xff] }
  0x61   : > { %494 = vmatmul.f32.gmra.mxu0 %v370_v13  ;;  %607 = vmatmul.f32.gmra.mxu1 %v370_v13  ;;  %v1093_v54 = vld [vmem:[#allocation9 + $0x30] sm:$0xff]  ;;  %v386_v1 = vld [vmem:[%s2405_s11 + $0x88] sm:$0xff] }
  0x62   : > { %720 = vmatmul.f32.gmra.mxu2 %v370_v13  ;;  %833 = vmatmul.f32.gmra.mxu3 %v370_v13  ;;  %v1109_v55 = vld [vmem:[#allocation9 + $0xb0] sm:$0xff]  ;;  %v1092_v2 = vld [vmem:[#allocation9 + $0x28] sm:$0xff]  ;;  %v1139_v10 = vld [vmem:[#allocation9 + $0x1a0] sm:$0xff] }
  0x63   : > { %1380 = vmatpush.msrb.mxu2 %v1131_v15  ;;  %1493 = vmatpush.msrb.mxu3 %v1147_v16  ;;  %v1108_v3 = vld [vmem:[#allocation9 + $0xa8] sm:$0xff]  ;;  %v388_v15 = vld [vmem:[%s2405_s11 + $0x98] sm:$0xff]  ;;  %v1091_v16 = vld [vmem:[#allocation9 + $0x20] sm:$0xff] }
  0x64   : > { %1154 = vmatpush.msrb.mxu0 %v1099_v17  ;;  %1267 = vmatpush.msrb.mxu1 %v1115_v18  ;;  %v387_v8 = vld [vmem:[%s2405_s11 + $0x90] sm:$0xff]  ;;  %v1107_v17 = vld [vmem:[#allocation9 + $0xa0] sm:$0xff] }
  0x65   : > { %1381 = vmatpush.msrb.mxu2 %v1130_v21  ;;  %1494 = vmatpush.msrb.mxu3 %v1146_v22  ;;  %v389_v22 = vld [vmem:[%s2405_s11 + $0xa0] sm:$0xff] }
  0x66   : > { %1155 = vmatpush.msrb.mxu0 %v1098_v23  ;;  %1268 = vmatpush.msrb.mxu1 %v1114_v24  ;;  %v1122_v23 = vld [vmem:[#allocation9 + $0x118] sm:$0xff] }
  0x67   : > { %1382 = vmatpush.msrb.mxu2 %v1129_v27  ;;  %1495 = vmatpush.msrb.mxu3 %v1145_v28  ;;  %v1138_v24 = vld [vmem:[#allocation9 + $0x198] sm:$0xff] }
  0x68   : > { %1156 = vmatpush.msrb.mxu0 %v1097_v29  ;;  %1269 = vmatpush.msrb.mxu1 %v1113_v30  ;;  %v390_v29 = vld [vmem:[%s2405_s11 + $0xa8] sm:$0xff]  ;;  %v1090_v30 = vld [vmem:[#allocation9 + $0x18] sm:$0xff] }
  0x69   : > { %497 = vmatmul.f32.gmra.mxu0 %v371_v14  ;;  %610 = vmatmul.f32.gmra.mxu1 %v371_v14 }
  0x6a   : > { %723 = vmatmul.f32.gmra.mxu2 %v371_v14  ;;  %836 = vmatmul.f32.gmra.mxu3 %v371_v14 }
  0x6b   : > { %1383 = vmatpush.msrb.mxu2 %v1128_v33  ;;  %1496 = vmatpush.msrb.mxu3 %v1144_v34 }
  0x6c   : > { %1157 = vmatpush.msrb.mxu0 %v1096_v35  ;;  %1270 = vmatpush.msrb.mxu1 %v1112_v36  ;;  %v391_v36 = vld [vmem:[%s2405_s11 + $0xb0] sm:$0xff] }
  0x6d   : > { %1384 = vmatpush.msrb.mxu2 %v1127_v39  ;;  %1497 = vmatpush.msrb.mxu3 %v1143_v40 }
  0x6e   : > { %1158 = vmatpush.msrb.mxu0 %v1095_v41  ;;  %1271 = vmatpush.msrb.mxu1 %v1111_v42 }
  0x6f   : > { %1385 = vmatpush.msrb.mxu2 %v1126_v45  ;;  %1498 = vmatpush.msrb.mxu3 %v1142_v46  ;;  %v1105_v45 = vld [vmem:[#allocation9 + $0x90] sm:$0xff] }
  0x70   : > { %1159 = vmatpush.msrb.mxu0 %v1094_v48  ;;  %1272 = vmatpush.msrb.mxu1 %v1110_v49 }
  0x71   : > { %500 = vmatmul.f32.gmra.mxu0 %v372_v19  ;;  %613 = vmatmul.f32.gmra.mxu1 %v372_v19 }
  0x72   : > { %726 = vmatmul.f32.gmra.mxu2 %v372_v19  ;;  %839 = vmatmul.f32.gmra.mxu3 %v372_v19 }
  0x73   : > { %1386 = vmatpush.msrb.mxu2 %v1125_v51  ;;  %1499 = vmatpush.msrb.mxu3 %v1141_v52  ;;  %v1120_v51 = vld [vmem:[#allocation9 + $0x108] sm:$0xff] }
  0x74   : > { %1160 = vmatpush.msrb.mxu0 %v1093_v54  ;;  %1273 = vmatpush.msrb.mxu1 %v1109_v55  ;;  %v1136_v52 = vld [vmem:[#allocation9 + $0x188] sm:$0xff] }
  0x75   : > { %1387 = vmatpush.msrb.mxu2 %v1124_v59  ;;  %1500 = vmatpush.msrb.mxu3 %v1140_v60  ;;  %v394_v59 = vld [vmem:[%s2405_s11 + $0xc8] sm:$0xff] }
  0x76   : > { %1161 = vmatpush.msrb.mxu0 %v1092_v2  ;;  %1274 = vmatpush.msrb.mxu1 %v1108_v3  ;;  %v1088_v60 = vld [vmem:[#allocation9 + $0x8] sm:$0xff] }
  0x77   : > { %1388 = vmatpush.msrb.mxu2 %v1123_v9  ;;  %1501 = vmatpush.msrb.mxu3 %v1139_v10  ;;  %v395_v10 = vld [vmem:[%s2405_s11 + $0xd0] sm:$0xff] }
  0x78   : > { %1162 = vmatpush.msrb.mxu0 %v1091_v16  ;;  %1275 = vmatpush.msrb.mxu1 %v1107_v17  ;;  %v1135_v16 = vld [vmem:[#allocation9 + $0x180] sm:$0xff] }
  0x79   : > { %503 = vmatmul.f32.gmra.mxu0 %v373_v20  ;;  %616 = vmatmul.f32.gmra.mxu1 %v373_v20 }
  0x7a   : > { %729 = vmatmul.f32.gmra.mxu2 %v373_v20  ;;  %842 = vmatmul.f32.gmra.mxu3 %v373_v20 }
  0x7b   : > { %1389 = vmatpush.msrb.mxu2 %v1122_v23  ;;  %1502 = vmatpush.msrb.mxu3 %v1138_v24 }
  0x7c   : > { %1163 = vmatpush.msrb.mxu0 %v1090_v30  ;;  %v1087_v30 = vld [vmem:[#allocation9] sm:$0xff] }
  0x81   : > { %506 = vmatmul.f32.gmra.mxu0 %v374_v25  ;;  %619 = vmatmul.f32.gmra.mxu1 %v374_v25 }
  0x82   : > { %732 = vmatmul.f32.gmra.mxu2 %v374_v25  ;;  %845 = vmatmul.f32.gmra.mxu3 %v374_v25 }
  0x89   : > { %509 = vmatmul.f32.gmra.mxu0 %v375_v26  ;;  %622 = vmatmul.f32.gmra.mxu1 %v375_v26 }
  0x8a   : > { %735 = vmatmul.f32.gmra.mxu2 %v375_v26  ;;  %848 = vmatmul.f32.gmra.mxu3 %v375_v26 }
  0x91   : > { %512 = vmatmul.f32.gmra.mxu0 %v376_v31  ;;  %625 = vmatmul.f32.gmra.mxu1 %v376_v31 }
  0x92   : > { %738 = vmatmul.f32.gmra.mxu2 %v376_v31  ;;  %851 = vmatmul.f32.gmra.mxu3 %v376_v31  ;;  %v1106_v31 = vld [vmem:[#allocation9 + $0x98] sm:$0xff] }
  0x93   : > { %1276 = vmatpush.msrb.mxu1 %v1106_v31  ;;  %v1103_v31 = vld [vmem:[#allocation9 + $0x80] sm:$0xff] }
  0x95   : > { %1277 = vmatpush.msrb.mxu1 %v1105_v45 }
  0x99   : > { %515 = vmatmul.f32.gmra.mxu0 %v377_v32  ;;  %628 = vmatmul.f32.gmra.mxu1 %v377_v32 }
  0x9a   : > { %741 = vmatmul.f32.gmra.mxu2 %v377_v32  ;;  %854 = vmatmul.f32.gmra.mxu3 %v377_v32 }
  0xa1   : > { %518 = vmatmul.f32.gmra.mxu0 %v378_v37  ;;  %631 = vmatmul.f32.gmra.mxu1 %v378_v37 }
  0xa2   : > { %744 = vmatmul.f32.gmra.mxu2 %v378_v37  ;;  %857 = vmatmul.f32.gmra.mxu3 %v378_v37  ;;  %v1121_v37 = vld [vmem:[#allocation9 + $0x110] sm:$0xff] }
  0xa3   : > { %1390 = vmatpush.msrb.mxu2 %v1121_v37 }
  0xa5   : > { %1391 = vmatpush.msrb.mxu2 %v1120_v51 }
  0xa9   : > { %521 = vmatmul.f32.gmra.mxu0 %v379_v38  ;;  %634 = vmatmul.f32.gmra.mxu1 %v379_v38 }
  0xaa   : > { %747 = vmatmul.f32.gmra.mxu2 %v379_v38  ;;  %860 = vmatmul.f32.gmra.mxu3 %v379_v38  ;;  %v1137_v38 = vld [vmem:[#allocation9 + $0x190] sm:$0xff] }
  0xab   : > { %1503 = vmatpush.msrb.mxu3 %v1137_v38 }
  0xad   : > { %1504 = vmatpush.msrb.mxu3 %v1136_v52 }
  0xaf   : > { %1505 = vmatpush.msrb.mxu3 %v1135_v16  ;;  %v399_v16 = vld [vmem:[%s2405_s11 + $0xf0] sm:$0xff] }
  0xb1   : > { %524 = vmatmul.f32.gmra.mxu0 %v380_v43  ;;  %637 = vmatmul.f32.gmra.mxu1 %v380_v43 }
  0xb2   : > { %750 = vmatmul.f32.gmra.mxu2 %v380_v43  ;;  %863 = vmatmul.f32.gmra.mxu3 %v380_v43  ;;  %v392_v43 = vld [vmem:[%s2405_s11 + $0xb8] sm:$0xff] }
  0xb9   : > { %527 = vmatmul.f32.gmra.mxu0 %v381_v44  ;;  %640 = vmatmul.f32.gmra.mxu1 %v381_v44 }
  0xba   : > { %753 = vmatmul.f32.gmra.mxu2 %v381_v44  ;;  %866 = vmatmul.f32.gmra.mxu3 %v381_v44  ;;  %v1089_v44 = vld [vmem:[#allocation9 + $0x10] sm:$0xff] }
  0xbb   : > { %1164 = vmatpush.msrb.mxu0 %v1089_v44  ;;  %v397_v44 = vld [vmem:[%s2405_s11 + $0xe0] sm:$0xff] }
  0xbd   : > { %1165 = vmatpush.msrb.mxu0 %v1088_v60 }
  0xbf   : > { %1166 = vmatpush.msrb.mxu0 %v1087_v30 }
  0xc1   : > { %530 = vmatmul.f32.gmra.mxu0 %v382_v47  ;;  %643 = vmatmul.f32.gmra.mxu1 %v382_v47 }
  0xc2   : > { %756 = vmatmul.f32.gmra.mxu2 %v382_v47  ;;  %869 = vmatmul.f32.gmra.mxu3 %v382_v47 }
  0xc9   : > { %533 = vmatmul.f32.gmra.mxu0 %v383_v50  ;;  %646 = vmatmul.f32.gmra.mxu1 %v383_v50 }
  0xca   : > { %759 = vmatmul.f32.gmra.mxu2 %v383_v50  ;;  %872 = vmatmul.f32.gmra.mxu3 %v383_v50  ;;  %v393_v50 = vld [vmem:[%s2405_s11 + $0xc0] sm:$0xff] }
  0xd1   : > { %536 = vmatmul.f32.gmra.mxu0 %v384_v53  ;;  %649 = vmatmul.f32.gmra.mxu1 %v384_v53 }
  0xd2   : > { %762 = vmatmul.f32.gmra.mxu2 %v384_v53  ;;  %875 = vmatmul.f32.gmra.mxu3 %v384_v53 }
  0xd6   : > { %v2435_v56 = vpop.f32.mrf.mxu0  ;;  %v2437_v57 = vpop.f32.mrf.mxu1 }
  0xd9   : > { %539 = vmatmul.f32.gmra.mxu0 %v385_v58  ;;  %652 = vmatmul.f32.gmra.mxu1 %v385_v58 }
  0xda   : > { %765 = vmatmul.f32.gmra.mxu2 %v385_v58  ;;  %878 = vmatmul.f32.gmra.mxu3 %v385_v58 }
  0xdd   : > { %v2440_v61 = vpop.f32.mrf.mxu2  ;;  %v2442_v62 = vpop.f32.mrf.mxu3 }
  0xde   : > { %v2444_v63 = vpop.f32.mrf.mxu0  ;;  %v2446_v0 = vpop.f32.mrf.mxu1 }
  0xe1   : > { %542 = vmatmul.f32.gmra.mxu0 %v386_v1  ;;  %655 = vmatmul.f32.gmra.mxu1 %v386_v1 }
  0xe2   : > { %768 = vmatmul.f32.gmra.mxu2 %v386_v1  ;;  %881 = vmatmul.f32.gmra.mxu3 %v386_v1  ;;  %v1104_v1 = vld [vmem:[#allocation9 + $0x88] sm:$0xff] }
  0xe3   : > { %1278 = vmatpush.msrb.mxu1 %v1104_v1 }
  0xe5   : > { %v2449_v4 = vpop.f32.mrf.mxu2  ;;  %v2451_v5 = vpop.f32.mrf.mxu3  ;;  %1279 = vmatpush.msrb.mxu1 %v1103_v31 }
  0xe6   : > { %v2453_v6 = vpop.f32.mrf.mxu0  ;;  %v2455_v7 = vpop.f32.mrf.mxu1 }
  0xe9   : > { %545 = vmatmul.f32.gmra.mxu0 %v387_v8  ;;  %658 = vmatmul.f32.gmra.mxu1 %v387_v8 }
  0xea   : > { %771 = vmatmul.f32.gmra.mxu2 %v387_v8  ;;  %884 = vmatmul.f32.gmra.mxu3 %v387_v8 }
  0xed   : > { %v2458_v11 = vpop.f32.mrf.mxu2  ;;  %v2460_v12 = vpop.f32.mrf.mxu3 }
  0xee   : > { %v2462_v13 = vpop.f32.mrf.mxu0  ;;  %v2464_v14 = vpop.f32.mrf.mxu1 }
  0xf1   : > { %548 = vmatmul.f32.gmra.mxu0 %v388_v15  ;;  %661 = vmatmul.f32.gmra.mxu1 %v388_v15 }
  0xf2   : > { %774 = vmatmul.f32.gmra.mxu2 %v388_v15  ;;  %887 = vmatmul.f32.gmra.mxu3 %v388_v15  ;;  %v1119_v15 = vld [vmem:[#allocation9 + $0x100] sm:$0xff] }
  0xf3   : > { %1392 = vmatpush.msrb.mxu2 %v1119_v15 }
  0xf5   : > { %v2467_v18 = vpop.f32.mrf.mxu2  ;;  %v2469_v19 = vpop.f32.mrf.mxu3 }
  0xf6   : > { %v2471_v20 = vpop.f32.mrf.mxu0  ;;  %v2473_v21 = vpop.f32.mrf.mxu1 }
  0xf9   : > { %551 = vmatmul.f32.gmra.mxu0 %v389_v22  ;;  %664 = vmatmul.f32.gmra.mxu1 %v389_v22 }
  0xfa   : > { %777 = vmatmul.f32.gmra.mxu2 %v389_v22  ;;  %890 = vmatmul.f32.gmra.mxu3 %v389_v22 }
  0xfd   : > { %v2476_v25 = vpop.f32.mrf.mxu2  ;;  %v2478_v26 = vpop.f32.mrf.mxu3 }
  0xfe   : > { %v2480_v27 = vpop.f32.mrf.mxu0  ;;  %v2482_v28 = vpop.f32.mrf.mxu1 }
 0x101   : > { %554 = vmatmul.f32.gmra.mxu0 %v390_v29  ;;  %667 = vmatmul.f32.gmra.mxu1 %v390_v29 }
 0x102   : > { %780 = vmatmul.f32.gmra.mxu2 %v390_v29  ;;  %893 = vmatmul.f32.gmra.mxu3 %v390_v29  ;;  %v396_v29 = vld [vmem:[%s2405_s11 + $0xd8] sm:$0xff] }
 0x105   : > { %v2485_v32 = vpop.f32.mrf.mxu2  ;;  %v2487_v33 = vpop.f32.mrf.mxu3 }
 0x106   : > { %v2489_v34 = vpop.f32.mrf.mxu0  ;;  %v2491_v35 = vpop.f32.mrf.mxu1 }
 0x109   : > { %557 = vmatmul.f32.gmra.mxu0 %v391_v36  ;;  %670 = vmatmul.f32.gmra.mxu1 %v391_v36 }
 0x10a   : > { %783 = vmatmul.f32.gmra.mxu2 %v391_v36  ;;  %896 = vmatmul.f32.gmra.mxu3 %v391_v36 }
 0x10d   : > { %v2494_v39 = vpop.f32.mrf.mxu2  ;;  %v2496_v40 = vpop.f32.mrf.mxu3 }
 0x10e   : > { %v2498_v41 = vpop.f32.mrf.mxu0  ;;  %v2500_v42 = vpop.f32.mrf.mxu1 }
 0x111   : > { %560 = vmatmul.f32.gmra.mxu0 %v392_v43  ;;  %673 = vmatmul.f32.gmra.mxu1 %v392_v43 }
 0x112   : > { %786 = vmatmul.f32.gmra.mxu2 %v392_v43  ;;  %899 = vmatmul.f32.gmra.mxu3 %v392_v43 }
 0x115   : > { %v2503_v46 = vpop.f32.mrf.mxu2  ;;  %v2505_v47 = vpop.f32.mrf.mxu3 }
 0x116   : > { %v2507_v48 = vpop.f32.mrf.mxu0  ;;  %v2509_v49 = vpop.f32.mrf.mxu1 }
 0x119   : > { %563 = vmatmul.f32.gmra.mxu0 %v393_v50  ;;  %676 = vmatmul.f32.gmra.mxu1 %v393_v50 }
 0x11a   : > { %789 = vmatmul.f32.gmra.mxu2 %v393_v50  ;;  %902 = vmatmul.f32.gmra.mxu3 %v393_v50 }
 0x11d   : > { %v2512_v53 = vpop.f32.mrf.mxu2  ;;  %v2514_v54 = vpop.f32.mrf.mxu3 }
 0x11e   : > { %v2516_v55 = vpop.f32.mrf.mxu0  ;;  %v2518_v58 = vpop.f32.mrf.mxu1 }
 0x121   : > { %566 = vmatmul.f32.gmra.mxu0 %v394_v59  ;;  %679 = vmatmul.f32.gmra.mxu1 %v394_v59 }
 0x122   : > { %792 = vmatmul.f32.gmra.mxu2 %v394_v59  ;;  %905 = vmatmul.f32.gmra.mxu3 %v394_v59  ;;  %v398_v59 = vld [vmem:[%s2405_s11 + $0xe8] sm:$0xff] }
 0x125   : > { %v2521_v2 = vpop.f32.mrf.mxu2  ;;  %v2523_v3 = vpop.f32.mrf.mxu3 }
 0x126   : > { %v2525_v8 = vpop.f32.mrf.mxu0  ;;  %v2527_v9 = vpop.f32.mrf.mxu1 }
 0x129   : > { %569 = vmatmul.f32.gmra.mxu0 %v395_v10  ;;  %682 = vmatmul.f32.gmra.mxu1 %v395_v10 }
 0x12a   : > { %795 = vmatmul.f32.gmra.mxu2 %v395_v10  ;;  %908 = vmatmul.f32.gmra.mxu3 %v395_v10 }
 0x12d   : > { %v2530_v17 = vpop.f32.mrf.mxu2  ;;  %v2532_v22 = vpop.f32.mrf.mxu3 }
 0x12e   : > { %v2534_v23 = vpop.f32.mrf.mxu0  ;;  %v2536_v24 = vpop.f32.mrf.mxu1 }
 0x131   : > { %572 = vmatmul.f32.gmra.mxu0 %v396_v29  ;;  %685 = vmatmul.f32.gmra.mxu1 %v396_v29 }
 0x132   : > { %798 = vmatmul.f32.gmra.mxu2 %v396_v29  ;;  %911 = vmatmul.f32.gmra.mxu3 %v396_v29  ;;  %v465_v29 = vld [vmem:[#allocation8] sm:$0xf] }
 0x135   : > { %v2539_v36 = vpop.f32.mrf.mxu2  ;;  %v2541_v37 = vpop.f32.mrf.mxu3 }
 0x136   : > { %v2543_v38 = vpop.f32.mrf.mxu0  ;;  %v2545_v43 = vpop.f32.mrf.mxu1 }
 0x137   : > { %3107 = vst [vmem:[#allocation16_spill] sm:$0xff] %v2545_v43 }
 0x139   : > { %575 = vmatmul.f32.gmra.mxu0 %v397_v44  ;;  %688 = vmatmul.f32.gmra.mxu1 %v397_v44 }
 0x13a   : > { %801 = vmatmul.f32.gmra.mxu2 %v397_v44  ;;  %914 = vmatmul.f32.gmra.mxu3 %v397_v44 }
 0x13d   : > { %v2548_v45 = vpop.f32.mrf.mxu2  ;;  %v2550_v50 = vpop.f32.mrf.mxu3 }
 0x13e   : > { %3108 = vst [vmem:[#allocation17_spill] sm:$0xff] %v2548_v45  ;;  %v2552_v51 = vpop.f32.mrf.mxu0  ;;  %v2554_v52 = vpop.f32.mrf.mxu1 }
 0x13f   : > { %3109 = vst [vmem:[#allocation18_spill] sm:$0xff] %v2550_v50 }
 0x140   : > { %3110 = vst [vmem:[#allocation19_spill] sm:$0xff] %v2552_v51 }
 0x141   : > { %3111 = vst [vmem:[#allocation20_spill] sm:$0xff] %v2554_v52  ;;  %578 = vmatmul.f32.gmra.mxu0 %v398_v59  ;;  %691 = vmatmul.f32.gmra.mxu1 %v398_v59  ;;  %v2581_v52 = vperm.slane %v465_v29, 3 }
 0x142   : > { %804 = vmatmul.f32.gmra.mxu2 %v398_v59  ;;  %917 = vmatmul.f32.gmra.mxu3 %v398_v59 }
 0x145   : > { %v2557_v60 = vpop.f32.mrf.mxu2  ;;  %v2559_v1 = vpop.f32.mrf.mxu3 }
 0x146   : > { %3112 = vst [vmem:[#allocation21_spill] sm:$0xff] %v2557_v60  ;;  %v2561_v10 = vpop.f32.mrf.mxu0  ;;  %v2563_v15 = vpop.f32.mrf.mxu1  ;;  %v400_v60 = vld [vmem:[%s2405_s11 + $0xf8] sm:$0xff] }
 0x147   : > { %3113 = vst [vmem:[#allocation22_spill] sm:$0xff] %v2559_v1  ;;  %v2575_v1 = vperm.slane %v465_v29, 0 }
 0x148   : > { %3114 = vst [vmem:[#allocation23_spill] sm:$0xff] %v2561_v10  ;;  %v2577_v10 = vperm.slane %v465_v29, 1 }
 0x149   : > { %3115 = vst [vmem:[#allocation24_spill] sm:$0xff] %v2563_v15  ;;  %581 = vmatmul.f32.gmra.mxu0 %v399_v16  ;;  %694 = vmatmul.f32.gmra.mxu1 %v399_v16  ;;  %v2579_v15 = vperm.slane %v465_v29, 2 }
 0x14a   : > { %807 = vmatmul.f32.gmra.mxu2 %v399_v16  ;;  %920 = vmatmul.f32.gmra.mxu3 %v399_v16  ;;  %v493_v16 = vadd.f32 %v2435_v56, %v2575_v1 }
 0x14d   : > { %v2566_v30 = vpop.f32.mrf.mxu2  ;;  %v2568_v31 = vpop.f32.mrf.mxu3 }
 0x14e   : > { %3116 = vst [vmem:[#allocation25_spill] sm:$0xff] %v2566_v30  ;;  %v2570_v44 = vpop.f32.mrf.mxu0  ;;  %v2572_v59 = vpop.f32.mrf.mxu1 }
 0x14f   : > { %3117 = vst [vmem:[#allocation26_spill] sm:$0xff] %v2568_v31  ;;  %v832_v31 = vadd.f32 %v2442_v62, %v2581_v52  ;;  %v722_v62 = vadd.f32 %v2449_v4, %v2579_v15  ;;  %v612_v4 = vadd.f32 %v2455_v7, %v2577_v10  ;;  %v502_v7 = vadd.f32 %v2462_v13, %v2575_v1 }
 0x150   : > { %3118 = vst [vmem:[#allocation27_spill] sm:$0xff] %v2570_v44  ;;  %v606_v44 = vadd.f32 %v2437_v57, %v2577_v10  ;;  %v496_v57 = vadd.f32 %v2444_v63, %v2575_v1 }
 0x151   : > { %3119 = vst [vmem:[#allocation28_spill] sm:$0xff] %v2572_v59  ;;  %584 = vmatmul.f32.gmra.mxu0 %v400_v60  ;;  %697 = vmatmul.f32.gmra.mxu1 %v400_v60  ;;  %v719_v59 = vadd.f32 %v2440_v61, %v2579_v15  ;;  %v930_v43 = vmax.f32 %v832_v31, 0.0  ;;  %v609_v61 = vadd.f32 %v2446_v0, %v2577_v10  ;;  %v933_v63 = vmax.f32 %v722_v62, 0.0 }
 0x152   : > { %810 = vmatmul.f32.gmra.mxu2 %v400_v60  ;;  %923 = vmatmul.f32.gmra.mxu3 %v400_v60  ;;  %v927_v60 = vmax.f32 %v493_v16, 0.0  ;;  %v928_v45 = vmax.f32 %v606_v44, 0.0  ;;  %v499_v0 = vadd.f32 %v2453_v6, %v2575_v1 }
 0x153   : > { %v929_v56 = vmax.f32 %v719_v59, 0.0  ;;  %v932_v59 = vmax.f32 %v609_v61, 0.0 }
 0x155   : > { %v2591_v30 = vpop.f32.mrf.mxu2  ;;  %v2593_v29 = vpop.f32.mrf.mxu3 }
 0x156   : > { %v2595_v51 = vpop.f32.mrf.mxu0  ;;  %v2597_v50 = vpop.f32.mrf.mxu1 }
 0x157   : > { %3120 = vst [vmem:[#allocation29_spill] sm:$0xff] %v2597_v50  ;;  %v835_v50 = vadd.f32 %v2451_v5, %v2581_v52  ;;  %v725_v5 = vadd.f32 %v2458_v11, %v2579_v15  ;;  %v615_v11 = vadd.f32 %v2464_v14, %v2577_v10  ;;  %v505_v14 = vadd.f32 %v2471_v20, %v2575_v1 }
 0x159   : > { %1167 = vmatmul.f32.vlgmr.msrb.gmra.mxu0 %v927_v60  ;;  %1280 = vmatmul.f32.vlgmr.msrb.gmra.mxu1 %v928_v45  ;;  %v934_v60 = vmax.f32 %v835_v50, 0.0  ;;  %v937_v6 = vmax.f32 %v725_v5, 0.0 }
 0x15a   : > { %1393 = vmatmul.f32.vlgmr.msrb.gmra.mxu2 %v929_v56  ;;  %1506 = vmatmul.f32.vlgmr.msrb.gmra.mxu3 %v930_v43  ;;  %v931_v43 = vmax.f32 %v496_v57, 0.0  ;;  %v838_v56 = vadd.f32 %v2460_v12, %v2581_v52  ;;  %v728_v12 = vadd.f32 %v2467_v18, %v2579_v15  ;;  %v618_v18 = vadd.f32 %v2473_v21, %v2577_v10 }
 0x15b   : > { %v508_v21 = vadd.f32 %v2480_v27, %v2575_v1 }
 0x15c   : > { %v941_v13 = vmax.f32 %v728_v12, 0.0 }
 0x15d   : > { %v2607_v16 = vpop.f32.mrf.mxu2  ;;  %v2609_v44 = vpop.f32.mrf.mxu3 }
 0x15e   : > { %v2611_v31 = vpop.f32.mrf.mxu0  ;;  %v2613_v45 = vpop.f32.mrf.mxu1 }
 0x161   : > { %1170 = vmatmul.f32.gmra.mxu0 %v931_v43  ;;  %1283 = vmatmul.f32.gmra.mxu1 %v932_v59  ;;  %v935_v43 = vmax.f32 %v499_v0, 0.0  ;;  %v936_v59 = vmax.f32 %v612_v4, 0.0 }
 0x162   : > { %1396 = vmatmul.f32.gmra.mxu2 %v933_v63  ;;  %1509 = vmatmul.f32.gmra.mxu3 %v934_v60  ;;  %v938_v63 = vmax.f32 %v838_v56, 0.0  ;;  %v841_v60 = vadd.f32 %v2469_v19, %v2581_v52  ;;  %v731_v19 = vadd.f32 %v2476_v25, %v2579_v15  ;;  %v621_v25 = vadd.f32 %v2482_v28, %v2577_v10 }
 0x163   : > { %v511_v28 = vadd.f32 %v2489_v34, %v2575_v1 }
 0x164   : > { %v945_v20 = vmax.f32 %v731_v19, 0.0 }
 0x165   : > { %v2623_v57 = vpop.f32.mrf.mxu2  ;;  %v2625_v61 = vpop.f32.mrf.mxu3 }
 0x166   : > { %v2627_v50 = vpop.f32.mrf.mxu0  ;;  %v2629_v62 = vpop.f32.mrf.mxu1 }
 0x169   : > { %1173 = vmatmul.f32.gmra.mxu0 %v935_v43  ;;  %1286 = vmatmul.f32.gmra.mxu1 %v936_v59  ;;  %v939_v43 = vmax.f32 %v502_v7, 0.0  ;;  %v940_v59 = vmax.f32 %v615_v11, 0.0 }
 0x16a   : > { %1399 = vmatmul.f32.gmra.mxu2 %v937_v6  ;;  %1512 = vmatmul.f32.gmra.mxu3 %v938_v63  ;;  %v942_v6 = vmax.f32 %v841_v60, 0.0  ;;  %v844_v63 = vadd.f32 %v2478_v26, %v2581_v52  ;;  %v734_v26 = vadd.f32 %v2485_v32, %v2579_v15  ;;  %v624_v32 = vadd.f32 %v2491_v35, %v2577_v10 }
 0x16b   : > { %v514_v35 = vadd.f32 %v2498_v41, %v2575_v1 }
 0x16c   : > { %v949_v27 = vmax.f32 %v734_v26, 0.0 }
 0x16d   : > { %v2639_v0 = vpop.f32.mrf.mxu2  ;;  %v2641_v4 = vpop.f32.mrf.mxu3 }
 0x16e   : > { %v2643_v5 = vpop.f32.mrf.mxu0  ;;  %v2645_v56 = vpop.f32.mrf.mxu1 }
 0x171   : > { %1176 = vmatmul.f32.gmra.mxu0 %v939_v43  ;;  %1289 = vmatmul.f32.gmra.mxu1 %v940_v59  ;;  %v943_v43 = vmax.f32 %v505_v14, 0.0  ;;  %v944_v59 = vmax.f32 %v618_v18, 0.0 }
 0x172   : > { %1402 = vmatmul.f32.gmra.mxu2 %v941_v13  ;;  %1515 = vmatmul.f32.gmra.mxu3 %v942_v6  ;;  %v946_v13 = vmax.f32 %v844_v63, 0.0  ;;  %v847_v6 = vadd.f32 %v2487_v33, %v2581_v52  ;;  %v737_v33 = vadd.f32 %v2494_v39, %v2579_v15  ;;  %v627_v39 = vadd.f32 %v2500_v42, %v2577_v10 }
 0x173   : > { %v517_v42 = vadd.f32 %v2507_v48, %v2575_v1 }
 0x174   : > { %v953_v34 = vmax.f32 %v737_v33, 0.0 }
 0x175   : > { %v2655_v7 = vpop.f32.mrf.mxu2  ;;  %v2657_v11 = vpop.f32.mrf.mxu3 }
 0x176   : > { %v2659_v12 = vpop.f32.mrf.mxu0  ;;  %v2661_v60 = vpop.f32.mrf.mxu1 }
 0x179   : > { %1179 = vmatmul.f32.gmra.mxu0 %v943_v43  ;;  %1292 = vmatmul.f32.gmra.mxu1 %v944_v59  ;;  %v947_v43 = vmax.f32 %v508_v21, 0.0  ;;  %v948_v59 = vmax.f32 %v621_v25, 0.0 }
 0x17a   : > { %1405 = vmatmul.f32.gmra.mxu2 %v945_v20  ;;  %1518 = vmatmul.f32.gmra.mxu3 %v946_v13  ;;  %v950_v20 = vmax.f32 %v847_v6, 0.0  ;;  %v850_v13 = vadd.f32 %v2496_v40, %v2581_v52  ;;  %v740_v40 = vadd.f32 %v2503_v46, %v2579_v15  ;;  %v630_v46 = vadd.f32 %v2509_v49, %v2577_v10 }
 0x17b   : > { %v520_v49 = vadd.f32 %v2516_v55, %v2575_v1 }
 0x17c   : > { %v957_v41 = vmax.f32 %v740_v40, 0.0 }
 0x17d   : > { %v2671_v14 = vpop.f32.mrf.mxu2  ;;  %v2673_v18 = vpop.f32.mrf.mxu3 }
 0x17e   : > { %v2675_v19 = vpop.f32.mrf.mxu0  ;;  %v2677_v63 = vpop.f32.mrf.mxu1 }
 0x181   : > { %1182 = vmatmul.f32.gmra.mxu0 %v947_v43  ;;  %1295 = vmatmul.f32.gmra.mxu1 %v948_v59  ;;  %v951_v43 = vmax.f32 %v511_v28, 0.0  ;;  %v952_v59 = vmax.f32 %v624_v32, 0.0 }
 0x182   : > { %1408 = vmatmul.f32.gmra.mxu2 %v949_v27  ;;  %1521 = vmatmul.f32.gmra.mxu3 %v950_v20  ;;  %v954_v27 = vmax.f32 %v850_v13, 0.0  ;;  %v853_v20 = vadd.f32 %v2505_v47, %v2581_v52  ;;  %v743_v47 = vadd.f32 %v2512_v53, %v2579_v15  ;;  %v633_v53 = vadd.f32 %v2518_v58, %v2577_v10 }
 0x183   : > { %v523_v58 = vadd.f32 %v2525_v8, %v2575_v1 }
 0x184   : > { %v961_v48 = vmax.f32 %v743_v47, 0.0 }
 0x185   : > { %v2687_v21 = vpop.f32.mrf.mxu2  ;;  %v2689_v25 = vpop.f32.mrf.mxu3 }
 0x186   : > { %v2691_v26 = vpop.f32.mrf.mxu0  ;;  %v2693_v6 = vpop.f32.mrf.mxu1 }
 0x189   : > { %1185 = vmatmul.f32.gmra.mxu0 %v951_v43  ;;  %1298 = vmatmul.f32.gmra.mxu1 %v952_v59  ;;  %v955_v43 = vmax.f32 %v514_v35, 0.0  ;;  %v956_v59 = vmax.f32 %v627_v39, 0.0 }
 0x18a   : > { %1411 = vmatmul.f32.gmra.mxu2 %v953_v34  ;;  %1524 = vmatmul.f32.gmra.mxu3 %v954_v27  ;;  %v958_v34 = vmax.f32 %v853_v20, 0.0  ;;  %v856_v27 = vadd.f32 %v2514_v54, %v2581_v52  ;;  %v746_v54 = vadd.f32 %v2521_v2, %v2579_v15  ;;  %v636_v2 = vadd.f32 %v2527_v9, %v2577_v10 }
 0x18b   : > { %v526_v9 = vadd.f32 %v2534_v23, %v2575_v1 }
 0x18c   : > { %v965_v55 = vmax.f32 %v746_v54, 0.0 }
 0x18d   : > { %v2703_v28 = vpop.f32.mrf.mxu2  ;;  %v2705_v32 = vpop.f32.mrf.mxu3 }
 0x18e   : > { %v2707_v33 = vpop.f32.mrf.mxu0  ;;  %v2709_v13 = vpop.f32.mrf.mxu1 }
 0x191   : > { %1188 = vmatmul.f32.gmra.mxu0 %v955_v43  ;;  %1301 = vmatmul.f32.gmra.mxu1 %v956_v59  ;;  %v959_v43 = vmax.f32 %v517_v42, 0.0  ;;  %v960_v59 = vmax.f32 %v630_v46, 0.0 }
 0x192   : > { %1414 = vmatmul.f32.gmra.mxu2 %v957_v41  ;;  %1527 = vmatmul.f32.gmra.mxu3 %v958_v34  ;;  %v962_v41 = vmax.f32 %v856_v27, 0.0  ;;  %v859_v34 = vadd.f32 %v2523_v3, %v2581_v52  ;;  %v749_v3 = vadd.f32 %v2530_v17, %v2579_v15  ;;  %v639_v17 = vadd.f32 %v2536_v24, %v2577_v10 }
 0x193   : > { %v529_v24 = vadd.f32 %v2543_v38, %v2575_v1 }
 0x194   : > { %v969_v8 = vmax.f32 %v749_v3, 0.0 }
 0x195   : > { %v2719_v35 = vpop.f32.mrf.mxu2  ;;  %v2721_v39 = vpop.f32.mrf.mxu3 }
 0x196   : > { %v2723_v40 = vpop.f32.mrf.mxu0  ;;  %v2725_v20 = vpop.f32.mrf.mxu1 }
 0x199   : > { %1191 = vmatmul.f32.gmra.mxu0 %v959_v43  ;;  %1304 = vmatmul.f32.gmra.mxu1 %v960_v59  ;;  %v963_v43 = vmax.f32 %v520_v49, 0.0  ;;  %v964_v59 = vmax.f32 %v633_v53, 0.0 }
 0x19a   : > { %1417 = vmatmul.f32.gmra.mxu2 %v961_v48  ;;  %1530 = vmatmul.f32.gmra.mxu3 %v962_v41  ;;  %v966_v48 = vmax.f32 %v859_v34, 0.0  ;;  %v862_v41 = vadd.f32 %v2532_v22, %v2581_v52  ;;  %v752_v22 = vadd.f32 %v2539_v36, %v2579_v15  ;;  %v3124_v36 = vld [vmem:[#allocation16_spill] sm:$0xff] }
 0x19c   : > { %v973_v23 = vmax.f32 %v752_v22, 0.0 }
 0x19d   : > { %v2735_v42 = vpop.f32.mrf.mxu2  ;;  %v2737_v46 = vpop.f32.mrf.mxu3 }
 0x19e   : > { %v2739_v47 = vpop.f32.mrf.mxu0  ;;  %v2741_v27 = vpop.f32.mrf.mxu1 }
 0x1a1   : > { %1194 = vmatmul.f32.gmra.mxu0 %v963_v43  ;;  %1307 = vmatmul.f32.gmra.mxu1 %v964_v59  ;;  %v967_v43 = vmax.f32 %v523_v58, 0.0  ;;  %v968_v59 = vmax.f32 %v636_v2, 0.0 }
 0x1a2   : > { %1420 = vmatmul.f32.gmra.mxu2 %v965_v55  ;;  %1533 = vmatmul.f32.gmra.mxu3 %v966_v48  ;;  %v970_v55 = vmax.f32 %v862_v41, 0.0  ;;  %v865_v48 = vadd.f32 %v2541_v37, %v2581_v52  ;;  %v642_v37 = vadd.f32 %v3124_v36, %v2577_v10 }
 0x1a5   : > { %v2751_v49 = vpop.f32.mrf.mxu2  ;;  %v2753_v53 = vpop.f32.mrf.mxu3 }
 0x1a6   : > { %v2755_v54 = vpop.f32.mrf.mxu0  ;;  %v2757_v34 = vpop.f32.mrf.mxu1 }
 0x1a9   : > { %1197 = vmatmul.f32.gmra.mxu0 %v967_v43  ;;  %1310 = vmatmul.f32.gmra.mxu1 %v968_v59  ;;  %v971_v43 = vmax.f32 %v526_v9, 0.0  ;;  %v972_v59 = vmax.f32 %v639_v17, 0.0 }
 0x1aa   : > { %1423 = vmatmul.f32.gmra.mxu2 %v969_v8  ;;  %1536 = vmatmul.f32.gmra.mxu3 %v970_v55  ;;  %v974_v8 = vmax.f32 %v865_v48, 0.0  ;;  %v3125_v55 = vld [vmem:[#allocation17_spill] sm:$0xff] }
 0x1ad   : > { %v2767_v58 = vpop.f32.mrf.mxu2  ;;  %v2769_v2 = vpop.f32.mrf.mxu3 }
 0x1ae   : > { %3121 = vst [vmem:[#allocation30_spill] sm:$0xff] %v2769_v2  ;;  %v2771_v3 = vpop.f32.mrf.mxu0  ;;  %v2773_v41 = vpop.f32.mrf.mxu1  ;;  %v755_v2 = vadd.f32 %v3125_v55, %v2579_v15 }
 0x1af   : > { %3122 = vst [vmem:[#allocation31_spill] sm:$0xff] %v2771_v3  ;;  %v3126_v3 = vld [vmem:[#allocation18_spill] sm:$0xff] }
 0x1b0   : > { %3123 = vst [vmem:[#allocation32_spill] sm:$0xff] %v2773_v41  ;;  %v868_v41 = vadd.f32 %v3126_v3, %v2581_v52  ;;  %v977_v38 = vmax.f32 %v755_v2, 0.0  ;;  %v3132_v3 = vld [vmem:[#allocation20_spill] sm:$0xff] }
 0x1b1   : > { %1200 = vmatmul.f32.gmra.mxu0 %v971_v43  ;;  %1313 = vmatmul.f32.gmra.mxu1 %v972_v59  ;;  %v975_v43 = vmax.f32 %v529_v24, 0.0  ;;  %v976_v59 = vmax.f32 %v642_v37, 0.0  ;;  %v645_v55 = vadd.f32 %v3132_v3, %v2577_v10 }
 0x1b2   : > { %1426 = vmatmul.f32.gmra.mxu2 %v973_v23  ;;  %1539 = vmatmul.f32.gmra.mxu3 %v974_v8  ;;  %v978_v23 = vmax.f32 %v868_v41, 0.0  ;;  %v3131_v8 = vld [vmem:[#allocation19_spill] sm:$0xff] }
 0x1b3   : > { %v532_v36 = vadd.f32 %v3131_v8, %v2575_v1 }
 0x1b5   : > { %v2783_v9 = vpop.f32.mrf.mxu2  ;;  %v2785_v17 = vpop.f32.mrf.mxu3 }
 0x1b6   : > { %3127 = vst [vmem:[#allocation16_spill] sm:$0xff] %v2783_v9  ;;  %v2787_v22 = vpop.f32.mrf.mxu0  ;;  %v2789_v48 = vpop.f32.mrf.mxu1 }
 0x1b7   : > { %3128 = vst [vmem:[#allocation17_spill] sm:$0xff] %v2785_v17  ;;  %v3133_v17 = vld [vmem:[#allocation21_spill] sm:$0xff] }
 0x1b8   : > { %3129 = vst [vmem:[#allocation18_spill] sm:$0xff] %v2787_v22  ;;  %v758_v9 = vadd.f32 %v3133_v17, %v2579_v15  ;;  %v3134_v22 = vld [vmem:[#allocation22_spill] sm:$0xff]  ;;  %v3139_v17 = vld [vmem:[#allocation23_spill] sm:$0xff] }
 0x1b9   : > { %3130 = vst [vmem:[#allocation33_spill] sm:$0xff] %v2789_v48  ;;  %1203 = vmatmul.f32.gmra.mxu0 %v975_v43  ;;  %1316 = vmatmul.f32.gmra.mxu1 %v976_v59  ;;  %v871_v48 = vadd.f32 %v3134_v22, %v2581_v52  ;;  %v979_v43 = vmax.f32 %v532_v36, 0.0  ;;  %v980_v59 = vmax.f32 %v645_v55, 0.0  ;;  %v535_v8 = vadd.f32 %v3139_v17, %v2575_v1  ;;  %v3140_v22 = vld [vmem:[#allocation24_spill] sm:$0xff] }
 0x1ba   : > { %1429 = vmatmul.f32.gmra.mxu2 %v977_v38  ;;  %1542 = vmatmul.f32.gmra.mxu3 %v978_v23  ;;  %v981_v38 = vmax.f32 %v758_v9, 0.0  ;;  %v648_v3 = vadd.f32 %v3140_v22, %v2577_v10 }
 0x1bb   : > { %v982_v23 = vmax.f32 %v871_v48, 0.0 }
 0x1bd   : > { %v2799_v24 = vpop.f32.mrf.mxu2  ;;  %v2801_v2 = vpop.f32.mrf.mxu3 }
 0x1be   : > { %3135 = vst [vmem:[#allocation19_spill] sm:$0xff] %v2799_v24  ;;  %v2803_v41 = vpop.f32.mrf.mxu0  ;;  %v2805_v37 = vpop.f32.mrf.mxu1 }
 0x1bf   : > { %3136 = vst [vmem:[#allocation20_spill] sm:$0xff] %v2801_v2  ;;  %v3141_v2 = vld [vmem:[#allocation25_spill] sm:$0xff] }
 0x1c0   : > { %3137 = vst [vmem:[#allocation21_spill] sm:$0xff] %v2803_v41  ;;  %v761_v24 = vadd.f32 %v3141_v2, %v2579_v15  ;;  %v3142_v41 = vld [vmem:[#allocation26_spill] sm:$0xff]  ;;  %v3145_v2 = vld [vmem:[#allocation27_spill] sm:$0xff] }
 0x1c1   : > { %3138 = vst [vmem:[#allocation22_spill] sm:$0xff] %v2805_v37  ;;  %1206 = vmatmul.f32.gmra.mxu0 %v979_v43  ;;  %1319 = vmatmul.f32.gmra.mxu1 %v980_v59  ;;  %v874_v37 = vadd.f32 %v3142_v41, %v2581_v52  ;;  %v983_v43 = vmax.f32 %v535_v8, 0.0  ;;  %v984_v59 = vmax.f32 %v648_v3, 0.0  ;;  %v538_v17 = vadd.f32 %v3145_v2, %v2575_v1  ;;  %v3146_v41 = vld [vmem:[#allocation28_spill] sm:$0xff] }
 0x1c2   : > { %1432 = vmatmul.f32.gmra.mxu2 %v981_v38  ;;  %1545 = vmatmul.f32.gmra.mxu3 %v982_v23  ;;  %v985_v38 = vmax.f32 %v761_v24, 0.0  ;;  %v651_v22 = vadd.f32 %v3146_v41, %v2577_v10  ;;  %v767_v41 = vadd.f32 %v2607_v16, %v2579_v15  ;;  %v657_v16 = vadd.f32 %v2613_v45, %v2577_v10 }
 0x1c3   : > { %v986_v23 = vmax.f32 %v874_v37, 0.0 }
 0x1c4   : > { %v996_v45 = vmax.f32 %v657_v16, 0.0 }
 0x1c5   : > { %v2815_v36 = vpop.f32.mrf.mxu2  ;;  %v2817_v9 = vpop.f32.mrf.mxu3 }
 0x1c6   : > { %3143 = vst [vmem:[#allocation23_spill] sm:$0xff] %v2817_v9  ;;  %v2819_v48 = vpop.f32.mrf.mxu0  ;;  %v2821_v55 = vpop.f32.mrf.mxu1  ;;  %v764_v9 = vadd.f32 %v2591_v30, %v2579_v15  ;;  %v541_v30 = vadd.f32 %v2595_v51, %v2575_v1  ;;  %v544_v51 = vadd.f32 %v2611_v31, %v2575_v1 }
 0x1c7   : > { %3144 = vst [vmem:[#allocation24_spill] sm:$0xff] %v2821_v55  ;;  %v877_v55 = vadd.f32 %v2593_v29, %v2581_v52  ;;  %v3148_v29 = vld [vmem:[#allocation29_spill] sm:$0xff] }
 0x1c8   : > { %v654_v2 = vadd.f32 %v3148_v29, %v2577_v10  ;;  %v883_v29 = vadd.f32 %v2625_v61, %v2581_v52 }
 0x1c9   : > { %1209 = vmatmul.f32.gmra.mxu0 %v983_v43  ;;  %1322 = vmatmul.f32.gmra.mxu1 %v984_v59  ;;  %v987_v43 = vmax.f32 %v538_v17, 0.0  ;;  %v988_v59 = vmax.f32 %v651_v22, 0.0 }
 0x1ca   : > { %1435 = vmatmul.f32.gmra.mxu2 %v985_v38  ;;  %1548 = vmatmul.f32.gmra.mxu3 %v986_v23  ;;  %v989_v38 = vmax.f32 %v764_v9, 0.0  ;;  %v990_v23 = vmax.f32 %v877_v55, 0.0 }
 0x1cd   : > { %v2831_v8 = vpop.f32.mrf.mxu2  ;;  %v2833_v24 = vpop.f32.mrf.mxu3 }
 0x1ce   : > { %v2835_v37 = vpop.f32.mrf.mxu0  ;;  %v2837_v3 = vpop.f32.mrf.mxu1 }
 0x1cf   : > { %3147 = vst [vmem:[#allocation25_spill] sm:$0xff] %v2837_v3  ;;  %v880_v3 = vadd.f32 %v2609_v44, %v2581_v52  ;;  %v770_v44 = vadd.f32 %v2623_v57, %v2579_v15 }
 0x1d1   : > { %1212 = vmatmul.f32.gmra.mxu0 %v987_v43  ;;  %1325 = vmatmul.f32.gmra.mxu1 %v988_v59  ;;  %v991_v43 = vmax.f32 %v541_v30, 0.0  ;;  %v992_v59 = vmax.f32 %v654_v2, 0.0 }
 0x1d2   : > { %1438 = vmatmul.f32.gmra.mxu2 %v989_v38  ;;  %1551 = vmatmul.f32.gmra.mxu3 %v990_v23  ;;  %v993_v38 = vmax.f32 %v767_v41, 0.0  ;;  %v994_v23 = vmax.f32 %v880_v3, 0.0 }
 0x1d5   : > { %v2847_v17 = vpop.f32.mrf.mxu2  ;;  %v2849_v9 = vpop.f32.mrf.mxu3 }
 0x1d6   : > { %3149 = vst [vmem:[#allocation26_spill] sm:$0xff] %v2849_v9  ;;  %v1168_v55 = vpop.f32.mrf.mxu0  ;;  %v1281_v22 = vpop.f32.mrf.mxu1  ;;  %v998_v9 = vmax.f32 %v883_v29, 0.0 }
 0x1d7   : > { %v1282_v30 = vadd.f32 %v1281_v22, %v1168_v55  ;;  %v547_v55 = vadd.f32 %v2627_v50, %v2575_v1  ;;  %v660_v22 = vadd.f32 %v2629_v62, %v2577_v10 }
 0x1d9   : > { %1215 = vmatmul.f32.gmra.mxu0 %v991_v43  ;;  %1328 = vmatmul.f32.gmra.mxu1 %v992_v59  ;;  %v2862_v43 = vld [vmem:[%s3087_s4] ss:$0 sm:$0xff]  ;;  %v1000_v62 = vmax.f32 %v660_v22, 0.0 }
 0x1da   : > { %1441 = vmatmul.f32.gmra.mxu2 %v993_v38  ;;  %1554 = vmatmul.f32.gmra.mxu3 %v994_v23  ;;  %v995_v38 = vmax.f32 %v544_v51, 0.0  ;;  %v997_v23 = vmax.f32 %v770_v44, 0.0  ;;  %v886_v51 = vadd.f32 %v2641_v4, %v2581_v52 }
 0x1dd   : > { %v1394_v2 = vpop.f32.mrf.mxu2  ;;  %v1507_v41 = vpop.f32.mrf.mxu3 }
 0x1de   : > { %v1395_v3 = vadd.f32 %v1394_v2, %v1282_v30  ;;  %v1171_v59 = vpop.f32.mrf.mxu0  ;;  %v1284_v31 = vpop.f32.mrf.mxu1  ;;  %v773_v30 = vadd.f32 %v2639_v0, %v2579_v15 }
 0x1df   : > { %v1285_v16 = vadd.f32 %v1284_v31, %v1171_v59  ;;  %v550_v59 = vadd.f32 %v2643_v5, %v2575_v1  ;;  %v663_v31 = vadd.f32 %v2645_v56, %v2577_v10 }
 0x1e0   : > { %v1508_v57 = vadd.f32 %v1507_v41, %v1395_v3  ;;  %v999_v41 = vmax.f32 %v547_v55, 0.0  ;;  %v1001_v3 = vmax.f32 %v773_v30, 0.0 }
 0x1e1   : > { %1218 = vmatmul.f32.gmra.mxu0 %v995_v38  ;;  %1331 = vmatmul.f32.gmra.mxu1 %v996_v45  ;;  %v1002_v38 = vmax.f32 %v886_v51, 0.0  ;;  %v776_v45 = vadd.f32 %v2655_v7, %v2579_v15  ;;  %v553_v7 = vadd.f32 %v2659_v12, %v2575_v1 }
 0x1e2   : > { %v1706_v61 = vadd.f32 %v2862_v43, %v1508_v57  ;;  %1444 = vmatmul.f32.gmra.mxu2 %v997_v23  ;;  %1557 = vmatmul.f32.gmra.mxu3 %v998_v9  ;;  %v889_v23 = vadd.f32 %v2657_v11, %v2581_v52  ;;  %v666_v11 = vadd.f32 %v2661_v60, %v2577_v10 }
 0x1e3   : > { %v1005_v5 = vmax.f32 %v776_v45, 0.0 }
 0x1e4   : > { %1738 = vst [vmem:[%s2875_s3] sm:$0xff] %v1706_v61 }
 0x1e5   : > { %v1397_v44 = vpop.f32.mrf.mxu2  ;;  %v1510_v9 = vpop.f32.mrf.mxu3 }
 0x1e6   : > { %v1398_v29 = vadd.f32 %v1397_v44, %v1285_v16  ;;  %v1174_v2 = vpop.f32.mrf.mxu0  ;;  %v1287_v50 = vpop.f32.mrf.mxu1  ;;  %v1003_v16 = vmax.f32 %v550_v59, 0.0  ;;  %v1004_v44 = vmax.f32 %v663_v31, 0.0  ;;  %v1007_v59 = vmax.f32 %v553_v7, 0.0 }
 0x1e7   : > { %v1288_v57 = vadd.f32 %v1287_v50, %v1174_v2  ;;  %v779_v2 = vadd.f32 %v2671_v14, %v2579_v15  ;;  %v892_v50 = vadd.f32 %v2673_v18, %v2581_v52  ;;  %v1008_v31 = vmax.f32 %v666_v11, 0.0 }
 0x1e8   : > { %v1511_v0 = vadd.f32 %v1510_v9, %v1398_v29  ;;  %v1006_v9 = vmax.f32 %v889_v23, 0.0  ;;  %v556_v14 = vadd.f32 %v2675_v19, %v2575_v1  ;;  %v669_v18 = vadd.f32 %v2677_v63, %v2577_v10 }
 0x1e9   : > { %1221 = vmatmul.f32.gmra.mxu0 %v999_v41  ;;  %1334 = vmatmul.f32.gmra.mxu1 %v1000_v62  ;;  %v1009_v12 = vmax.f32 %v779_v2, 0.0  ;;  %v1010_v45 = vmax.f32 %v892_v50, 0.0  ;;  %v785_v7 = vadd.f32 %v2703_v28, %v2579_v15  ;;  %v898_v11 = vadd.f32 %v2705_v32, %v2581_v52 }
 0x1ea   : > { %v1707_v4 = vadd.f32 %v2862_v43, %v1511_v0  ;;  %1447 = vmatmul.f32.gmra.mxu2 %v1001_v3  ;;  %1560 = vmatmul.f32.gmra.mxu3 %v1002_v38  ;;  %v562_v28 = vadd.f32 %v2707_v33, %v2575_v1  ;;  %v675_v32 = vadd.f32 %v2709_v13, %v2577_v10 }
 0x1ec   : > { %1739 = vst [vmem:[%s2875_s3 + $0x8] sm:$0xff] %v1707_v4 }
 0x1ed   : > { %v1400_v61 = vpop.f32.mrf.mxu2  ;;  %v1513_v55 = vpop.f32.mrf.mxu3 }
 0x1ee   : > { %v1401_v22 = vadd.f32 %v1400_v61, %v1288_v57  ;;  %v1177_v30 = vpop.f32.mrf.mxu0  ;;  %v1290_v51 = vpop.f32.mrf.mxu1  ;;  %v782_v57 = vadd.f32 %v2687_v21, %v2579_v15  ;;  %v895_v61 = vadd.f32 %v2689_v25, %v2581_v52  ;;  %v559_v21 = vadd.f32 %v2691_v26, %v2575_v1 }
 0x1ef   : > { %v1291_v41 = vadd.f32 %v1290_v51, %v1177_v30  ;;  %v672_v25 = vadd.f32 %v2693_v6, %v2577_v10  ;;  %v1017_v26 = vmax.f32 %v785_v7, 0.0 }
 0x1f0   : > { %v1514_v29 = vadd.f32 %v1513_v55, %v1401_v22  ;;  %v1013_v19 = vmax.f32 %v782_v57, 0.0 }
 0x1f1   : > { %1224 = vmatmul.f32.gmra.mxu0 %v1003_v16  ;;  %1337 = vmatmul.f32.gmra.mxu1 %v1004_v44 }
 0x1f2   : > { %v1708_v56 = vadd.f32 %v2862_v43, %v1514_v29  ;;  %1450 = vmatmul.f32.gmra.mxu2 %v1005_v5  ;;  %1563 = vmatmul.f32.gmra.mxu3 %v1006_v9  ;;  %v1011_v5 = vmax.f32 %v556_v14, 0.0  ;;  %v1012_v9 = vmax.f32 %v669_v18, 0.0  ;;  %v1014_v29 = vmax.f32 %v895_v61, 0.0 }
 0x1f4   : > { %1740 = vst [vmem:[%s2875_s3 + $0x10] sm:$0xff] %v1708_v56 }
 0x1f5   : > { %v1403_v62 = vpop.f32.mrf.mxu2  ;;  %v1516_v3 = vpop.f32.mrf.mxu3 }
 0x1f6   : > { %v1404_v38 = vadd.f32 %v1403_v62, %v1291_v41  ;;  %v1180_v0 = vpop.f32.mrf.mxu0  ;;  %v1293_v4 = vpop.f32.mrf.mxu1 }
 0x1f7   : > { %v1294_v55 = vadd.f32 %v1293_v4, %v1180_v0  ;;  %v1015_v0 = vmax.f32 %v559_v21, 0.0  ;;  %v1016_v4 = vmax.f32 %v672_v25, 0.0 }
 0x1f8   : > { %v1517_v23 = vadd.f32 %v1516_v3, %v1404_v38 }
 0x1f9   : > { %1227 = vmatmul.f32.gmra.mxu0 %v1007_v59  ;;  %1340 = vmatmul.f32.gmra.mxu1 %v1008_v31  ;;  %v1018_v59 = vmax.f32 %v898_v11, 0.0 }
 0x1fa   : > { %v1709_v60 = vadd.f32 %v2862_v43, %v1517_v23  ;;  %1453 = vmatmul.f32.gmra.mxu2 %v1009_v12  ;;  %1566 = vmatmul.f32.gmra.mxu3 %v1010_v45  ;;  %v788_v12 = vadd.f32 %v2719_v35, %v2579_v15  ;;  %v901_v45 = vadd.f32 %v2721_v39, %v2581_v52 }
 0x1fb   : > { %v565_v35 = vadd.f32 %v2723_v40, %v2575_v1  ;;  %v678_v39 = vadd.f32 %v2725_v20, %v2577_v10 }
 0x1fc   : > { %1741 = vst [vmem:[%s2875_s3 + $0x18] sm:$0xff] %v1709_v60  ;;  %v1021_v33 = vmax.f32 %v788_v12, 0.0 }
 0x1fd   : > { %v1406_v22 = vpop.f32.mrf.mxu2  ;;  %v1519_v30 = vpop.f32.mrf.mxu3  ;;  %v1023_v21 = vmax.f32 %v565_v35, 0.0  ;;  %v1024_v25 = vmax.f32 %v678_v39, 0.0  ;;  %v3153_v35 = vld [vmem:[#allocation16_spill] sm:$0xff] }
 0x1fe   : > { %v1407_v51 = vadd.f32 %v1406_v22, %v1294_v55  ;;  %v1183_v16 = vpop.f32.mrf.mxu0  ;;  %v1296_v44 = vpop.f32.mrf.mxu1  ;;  %v1019_v55 = vmax.f32 %v562_v28, 0.0  ;;  %v1020_v22 = vmax.f32 %v675_v32, 0.0  ;;  %v797_v28 = vadd.f32 %v2767_v58, %v2579_v15  ;;  %v3150_v32 = vld [vmem:[#allocation30_spill] sm:$0xff]  ;;  %v3151_v58 = vld [vmem:[#allocation31_spill] sm:$0xff] }
 0x1ff   : > { %v1297_v2 = vadd.f32 %v1296_v44, %v1183_v16  ;;  %v791_v16 = vadd.f32 %v2735_v42, %v2579_v15  ;;  %v904_v44 = vadd.f32 %v2737_v46, %v2581_v52  ;;  %v568_v42 = vadd.f32 %v2739_v47, %v2575_v1 }
 0x200   : > { %v1520_v56 = vadd.f32 %v1519_v30, %v1407_v51  ;;  %v1022_v30 = vmax.f32 %v901_v45, 0.0  ;;  %v681_v46 = vadd.f32 %v2741_v27, %v2577_v10  ;;  %v910_v12 = vadd.f32 %v3150_v32, %v2581_v52 }
 0x201   : > { %1230 = vmatmul.f32.gmra.mxu0 %v1011_v5  ;;  %1343 = vmatmul.f32.gmra.mxu1 %v1012_v9  ;;  %v1025_v40 = vmax.f32 %v791_v16, 0.0  ;;  %v1026_v7 = vmax.f32 %v904_v44, 0.0  ;;  %v800_v39 = vadd.f32 %v3153_v35, %v2579_v15  ;;  %v3154_v16 = vld [vmem:[#allocation17_spill] sm:$0xff] }
 0x202   : > { %v1710_v63 = vadd.f32 %v2862_v43, %v1520_v56  ;;  %1456 = vmatmul.f32.gmra.mxu2 %v1013_v19  ;;  %1569 = vmatmul.f32.gmra.mxu3 %v1014_v29  ;;  %v913_v44 = vadd.f32 %v3154_v16, %v2581_v52  ;;  %v3162_v16 = vld [vmem:[#allocation24_spill] sm:$0xff] }
 0x204   : > { %1742 = vst [vmem:[%s2875_s3 + $0x20] sm:$0xff] %v1710_v63 }
 0x205   : > { %v1409_v50 = vpop.f32.mrf.mxu2  ;;  %v1522_v41 = vpop.f32.mrf.mxu3 }
 0x206   : > { %v1410_v62 = vadd.f32 %v1409_v50, %v1297_v2  ;;  %v1186_v3 = vpop.f32.mrf.mxu0  ;;  %v1299_v38 = vpop.f32.mrf.mxu1  ;;  %v794_v2 = vadd.f32 %v2751_v49, %v2579_v15  ;;  %v907_v50 = vadd.f32 %v2753_v53, %v2581_v52  ;;  %v571_v49 = vadd.f32 %v2755_v54, %v2575_v1 }
 0x207   : > { %v1300_v23 = vadd.f32 %v1299_v38, %v1186_v3  ;;  %v684_v53 = vadd.f32 %v2757_v34, %v2577_v10  ;;  %v1033_v54 = vmax.f32 %v797_v28, 0.0 }
 0x208   : > { %v1523_v31 = vadd.f32 %v1522_v41, %v1410_v62  ;;  %v1029_v47 = vmax.f32 %v794_v2, 0.0  ;;  %v3156_v2 = vld [vmem:[#allocation33_spill] sm:$0xff] }
 0x209   : > { %1233 = vmatmul.f32.gmra.mxu0 %v1015_v0  ;;  %1346 = vmatmul.f32.gmra.mxu1 %v1016_v4 }
 0x20a   : > { %v1711_v6 = vadd.f32 %v2862_v43, %v1523_v31  ;;  %1459 = vmatmul.f32.gmra.mxu2 %v1017_v26  ;;  %1572 = vmatmul.f32.gmra.mxu3 %v1018_v59  ;;  %v1027_v26 = vmax.f32 %v568_v42, 0.0  ;;  %v1028_v59 = vmax.f32 %v681_v46, 0.0  ;;  %v1030_v31 = vmax.f32 %v907_v50, 0.0  ;;  %v3155_v42 = vld [vmem:[#allocation18_spill] sm:$0xff] }
 0x20b   : > { %v577_v46 = vadd.f32 %v3155_v42, %v2575_v1  ;;  %v690_v50 = vadd.f32 %v3156_v2, %v2577_v10  ;;  %v3163_v42 = vld [vmem:[#allocation25_spill] sm:$0xff]  ;;  %v812_v2 = vadd.f32 %v2847_v17, %v2579_v15 }
 0x20c   : > { %1743 = vst [vmem:[%s2875_s3 + $0x28] sm:$0xff] %v1711_v6 }
 0x20d   : > { %v1412_v60 = vpop.f32.mrf.mxu2  ;;  %v1525_v14 = vpop.f32.mrf.mxu3 }
 0x20e   : > { %v1413_v18 = vadd.f32 %v1412_v60, %v1300_v23  ;;  %v1189_v57 = vpop.f32.mrf.mxu0  ;;  %v1302_v61 = vpop.f32.mrf.mxu1 }
 0x20f   : > { %v1303_v5 = vadd.f32 %v1302_v61, %v1189_v57  ;;  %v1031_v61 = vmax.f32 %v571_v49, 0.0 }
 0x210   : > { %v1526_v51 = vadd.f32 %v1525_v14, %v1413_v18 }
 0x211   : > { %1236 = vmatmul.f32.gmra.mxu0 %v1019_v55  ;;  %1349 = vmatmul.f32.gmra.mxu1 %v1020_v22  ;;  %v1032_v55 = vmax.f32 %v684_v53, 0.0  ;;  %v1034_v22 = vmax.f32 %v910_v12, 0.0  ;;  %v3159_v12 = vld [vmem:[#allocation21_spill] sm:$0xff] }
 0x212   : > { %v1712_v13 = vadd.f32 %v2862_v43, %v1526_v51  ;;  %1462 = vmatmul.f32.gmra.mxu2 %v1021_v33  ;;  %1575 = vmatmul.f32.gmra.mxu3 %v1022_v30  ;;  %v574_v30 = vadd.f32 %v3151_v58, %v2575_v1  ;;  %v3152_v51 = vld [vmem:[#allocation32_spill] sm:$0xff] }
 0x214   : > { %1744 = vst [vmem:[%s2875_s3 + $0x30] sm:$0xff] %v1712_v13  ;;  %v687_v13 = vadd.f32 %v3152_v51, %v2577_v10 }
 0x215   : > { %v1415_v9 = vpop.f32.mrf.mxu2  ;;  %v1528_v19 = vpop.f32.mrf.mxu3 }
 0x216   : > { %v1416_v29 = vadd.f32 %v1415_v9, %v1303_v5  ;;  %v1192_v56 = vpop.f32.mrf.mxu0  ;;  %v1305_v63 = vpop.f32.mrf.mxu1 }
 0x217   : > { %v1306_v41 = vadd.f32 %v1305_v63, %v1192_v56 }
 0x218   : > { %v1529_v11 = vadd.f32 %v1528_v19, %v1416_v29 }
 0x219   : > { %1239 = vmatmul.f32.gmra.mxu0 %v1023_v21  ;;  %1352 = vmatmul.f32.gmra.mxu1 %v1024_v25  ;;  %v1035_v21 = vmax.f32 %v574_v30, 0.0  ;;  %v1036_v25 = vmax.f32 %v687_v13, 0.0 }
 0x21a   : > { %v1713_v20 = vadd.f32 %v2862_v43, %v1529_v11  ;;  %1465 = vmatmul.f32.gmra.mxu2 %v1025_v40  ;;  %1578 = vmatmul.f32.gmra.mxu3 %v1026_v7  ;;  %v1037_v40 = vmax.f32 %v800_v39, 0.0  ;;  %v1038_v7 = vmax.f32 %v913_v44, 0.0  ;;  %v583_v39 = vadd.f32 %v2819_v48, %v2575_v1 }
 0x21b   : > { %v696_v44 = vadd.f32 %v3162_v16, %v2577_v10 }
 0x21c   : > { %1745 = vst [vmem:[%s2875_s3 + $0x38] sm:$0xff] %v1713_v20 }
 0x21d   : > { %v1418_v62 = vpop.f32.mrf.mxu2  ;;  %v1531_v3 = vpop.f32.mrf.mxu3 }
 0x21e   : > { %v1419_v38 = vadd.f32 %v1418_v62, %v1306_v41  ;;  %v1195_v0 = vpop.f32.mrf.mxu0  ;;  %v1308_v4 = vpop.f32.mrf.mxu1  ;;  %v3157_v41 = vld [vmem:[#allocation19_spill] sm:$0xff] }
 0x21f   : > { %v1309_v45 = vadd.f32 %v1308_v4, %v1195_v0  ;;  %v803_v62 = vadd.f32 %v3157_v41, %v2579_v15 }
 0x220   : > { %v1532_v6 = vadd.f32 %v1531_v3, %v1419_v38  ;;  %v3158_v3 = vld [vmem:[#allocation20_spill] sm:$0xff] }
 0x221   : > { %1242 = vmatmul.f32.gmra.mxu0 %v1027_v26  ;;  %1355 = vmatmul.f32.gmra.mxu1 %v1028_v59  ;;  %v916_v38 = vadd.f32 %v3158_v3, %v2581_v52  ;;  %v1041_v49 = vmax.f32 %v803_v62, 0.0 }
 0x222   : > { %v1714_v27 = vadd.f32 %v2862_v43, %v1532_v6  ;;  %1468 = vmatmul.f32.gmra.mxu2 %v1029_v47  ;;  %1581 = vmatmul.f32.gmra.mxu3 %v1030_v31  ;;  %v1039_v6 = vmax.f32 %v577_v46, 0.0  ;;  %v699_v46 = vadd.f32 %v3163_v42, %v2577_v10 }
 0x223   : > { %v1042_v53 = vmax.f32 %v916_v38, 0.0 }
 0x224   : > { %1746 = vst [vmem:[%s2875_s3 + $0x40] sm:$0xff] %v1714_v27  ;;  %v1040_v27 = vmax.f32 %v690_v50, 0.0  ;;  %v3164_v50 = vld [vmem:[#allocation26_spill] sm:$0xff] }
 0x225   : > { %v1421_v23 = vpop.f32.mrf.mxu2  ;;  %v1534_v60 = vpop.f32.mrf.mxu3  ;;  %v925_v41 = vadd.f32 %v3164_v50, %v2581_v52 }
 0x226   : > { %v1422_v14 = vadd.f32 %v1421_v23, %v1309_v45  ;;  %v1198_v18 = vpop.f32.mrf.mxu0  ;;  %v1311_v57 = vpop.f32.mrf.mxu1  ;;  %v580_v45 = vadd.f32 %v3159_v12, %v2575_v1  ;;  %v3160_v23 = vld [vmem:[#allocation22_spill] sm:$0xff] }
 0x227   : > { %v1312_v5 = vadd.f32 %v1311_v57, %v1198_v18  ;;  %v3161_v18 = vld [vmem:[#allocation23_spill] sm:$0xff] }
 0x228   : > { %v1535_v33 = vadd.f32 %v1534_v60, %v1422_v14  ;;  %v693_v60 = vadd.f32 %v3160_v23, %v2577_v10  ;;  %v806_v14 = vadd.f32 %v2815_v36, %v2579_v15  ;;  %v919_v57 = vadd.f32 %v3161_v18, %v2581_v52 }
 0x229   : > { %1245 = vmatmul.f32.gmra.mxu0 %v1031_v61  ;;  %1358 = vmatmul.f32.gmra.mxu1 %v1032_v55  ;;  %v1043_v58 = vmax.f32 %v580_v45, 0.0 }
 0x22a   : > { %v1715_v34 = vadd.f32 %v2862_v43, %v1535_v33  ;;  %1471 = vmatmul.f32.gmra.mxu2 %v1033_v54  ;;  %1584 = vmatmul.f32.gmra.mxu3 %v1034_v22  ;;  %v1044_v30 = vmax.f32 %v693_v60, 0.0  ;;  %v1045_v51 = vmax.f32 %v806_v14, 0.0  ;;  %v1046_v13 = vmax.f32 %v919_v57, 0.0 }
 0x22c   : > { %1747 = vst [vmem:[%s2875_s3 + $0x48] sm:$0xff] %v1715_v34 }
 0x22d   : > { %v1424_v9 = vpop.f32.mrf.mxu2  ;;  %v1537_v19 = vpop.f32.mrf.mxu3 }
 0x22e   : > { %v1425_v29 = vadd.f32 %v1424_v9, %v1312_v5  ;;  %v1201_v56 = vpop.f32.mrf.mxu0  ;;  %v1314_v63 = vpop.f32.mrf.mxu1  ;;  %v809_v5 = vadd.f32 %v2831_v8, %v2579_v15  ;;  %v922_v9 = vadd.f32 %v2833_v24, %v2581_v52  ;;  %v586_v24 = vadd.f32 %v2835_v37, %v2575_v1 }
 0x22f   : > { %v1315_v0 = vadd.f32 %v1314_v63, %v1201_v56  ;;  %v1053_v1 = vmax.f32 %v812_v2, 0.0  ;;  %v1054_v37 = vmax.f32 %v925_v41, 0.0 }
 0x230   : > { %v1538_v11 = vadd.f32 %v1537_v19, %v1425_v29  ;;  %v1049_v48 = vmax.f32 %v809_v5, 0.0 }
 0x231   : > { %1248 = vmatmul.f32.gmra.mxu0 %v1035_v21  ;;  %1361 = vmatmul.f32.gmra.mxu1 %v1036_v25 }
 0x232   : > { %v1716_v20 = vadd.f32 %v2862_v43, %v1538_v11  ;;  %1474 = vmatmul.f32.gmra.mxu2 %v1037_v40  ;;  %1587 = vmatmul.f32.gmra.mxu3 %v1038_v7  ;;  %v1047_v40 = vmax.f32 %v583_v39, 0.0  ;;  %v1048_v7 = vmax.f32 %v696_v44, 0.0  ;;  %v1050_v11 = vmax.f32 %v922_v9, 0.0 }
 0x234   : > { %1748 = vst [vmem:[%s2875_s3 + $0x50] sm:$0xff] %v1716_v20 }
 0x235   : > { %v1427_v4 = vpop.f32.mrf.mxu2  ;;  %v1540_v26 = vpop.f32.mrf.mxu3 }
 0x236   : > { %v1428_v59 = vadd.f32 %v1427_v4, %v1315_v0  ;;  %v1204_v47 = vpop.f32.mrf.mxu0  ;;  %v1317_v31 = vpop.f32.mrf.mxu1 }
 0x237   : > { %v1318_v61 = vadd.f32 %v1317_v31, %v1204_v47  ;;  %v1052_v47 = vmax.f32 %v699_v46, 0.0 }
 0x238   : > { %v1541_v28 = vadd.f32 %v1540_v26, %v1428_v59  ;;  %v1051_v59 = vmax.f32 %v586_v24, 0.0 }
 0x239   : > { %1251 = vmatmul.f32.gmra.mxu0 %v1039_v6  ;;  %1364 = vmatmul.f32.gmra.mxu1 %v1040_v27 }
 0x23a   : > { %v1717_v32 = vadd.f32 %v2862_v43, %v1541_v28  ;;  %1477 = vmatmul.f32.gmra.mxu2 %v1041_v49  ;;  %1590 = vmatmul.f32.gmra.mxu3 %v1042_v53 }
 0x23c   : > { %1749 = vst [vmem:[%s2875_s3 + $0x58] sm:$0xff] %v1717_v32 }
 0x23d   : > { %v1430_v55 = vpop.f32.mrf.mxu2  ;;  %v1543_v54 = vpop.f32.mrf.mxu3 }
 0x23e   : > { %v1431_v22 = vadd.f32 %v1430_v55, %v1318_v61  ;;  %v1207_v33 = vpop.f32.mrf.mxu0  ;;  %v1320_v34 = vpop.f32.mrf.mxu1 }
 0x23f   : > { %v1321_v19 = vadd.f32 %v1320_v34, %v1207_v33 }
 0x240   : > { %v1544_v35 = vadd.f32 %v1543_v54, %v1431_v22 }
 0x241   : > { %1254 = vmatmul.f32.gmra.mxu0 %v1043_v58  ;;  %1367 = vmatmul.f32.gmra.mxu1 %v1044_v30 }
 0x242   : > { %v1718_v36 = vadd.f32 %v2862_v43, %v1544_v35  ;;  %1480 = vmatmul.f32.gmra.mxu2 %v1045_v51  ;;  %1593 = vmatmul.f32.gmra.mxu3 %v1046_v13 }
 0x244   : > { %1750 = vst [vmem:[%s2875_s3 + $0x60] sm:$0xff] %v1718_v36 }
 0x245   : > { %v1433_v29 = vpop.f32.mrf.mxu2  ;;  %v1546_v56 = vpop.f32.mrf.mxu3 }
 0x246   : > { %v1434_v63 = vadd.f32 %v1433_v29, %v1321_v19  ;;  %v1210_v21 = vpop.f32.mrf.mxu0  ;;  %v1323_v25 = vpop.f32.mrf.mxu1 }
 0x247   : > { %v1324_v62 = vadd.f32 %v1323_v25, %v1210_v21 }
 0x248   : > { %v1547_v20 = vadd.f32 %v1546_v56, %v1434_v63 }
 0x249   : > { %1257 = vmatmul.f32.gmra.mxu0 %v1047_v40  ;;  %1370 = vmatmul.f32.gmra.mxu1 %v1048_v7 }
 0x24a   : > { %v1719_v8 = vadd.f32 %v2862_v43, %v1547_v20  ;;  %1483 = vmatmul.f32.gmra.mxu2 %v1049_v48  ;;  %1596 = vmatmul.f32.gmra.mxu3 %v1050_v11 }
 0x24c   : > { %1751 = vst [vmem:[%s2875_s3 + $0x68] sm:$0xff] %v1719_v8 }
 0x24d   : > { %v1436_v3 = vpop.f32.mrf.mxu2  ;;  %v1549_v38 = vpop.f32.mrf.mxu3 }
 0x24e   : > { %v1437_v0 = vadd.f32 %v1436_v3, %v1324_v62  ;;  %v1213_v4 = vpop.f32.mrf.mxu0  ;;  %v1326_v26 = vpop.f32.mrf.mxu1 }
 0x24f   : > { %v1327_v52 = vadd.f32 %v1326_v26, %v1213_v4 }
 0x250   : > { %v1550_v10 = vadd.f32 %v1549_v38, %v1437_v0 }
 0x251   : > { %1260 = vmatmul.f32.gmra.mxu0 %v1051_v59  ;;  %1373 = vmatmul.f32.gmra.mxu1 %v1052_v47 }
 0x252   : > { %v1720_v15 = vadd.f32 %v2862_v43, %v1550_v10  ;;  %1486 = vmatmul.f32.gmra.mxu2 %v1053_v1  ;;  %1599 = vmatmul.f32.gmra.mxu3 %v1054_v37 }
 0x254   : > { %1752 = vst [vmem:[%s2875_s3 + $0x70] sm:$0xff] %v1720_v15 }
 0x255   : > { %v1439_v17 = vpop.f32.mrf.mxu2  ;;  %v1552_v31 = vpop.f32.mrf.mxu3 }
 0x256   : > { %v1440_v6 = vadd.f32 %v1439_v17, %v1327_v52  ;;  %v1216_v27 = vpop.f32.mrf.mxu0  ;;  %v1329_v49 = vpop.f32.mrf.mxu1 }
 0x257   : > { %v1330_v32 = vadd.f32 %v1329_v49, %v1216_v27 }
 0x258   : > { %v1553_v53 = vadd.f32 %v1552_v31, %v1440_v6 }
 0x25a   : > { %v1721_v28 = vadd.f32 %v2862_v43, %v1553_v53 }
 0x25c   : > { %1753 = vst [vmem:[%s2875_s3 + $0x78] sm:$0xff] %v1721_v28 }
 0x25d   : > { %v1442_v12 = vpop.f32.mrf.mxu2  ;;  %v1555_v45 = vpop.f32.mrf.mxu3 }
 0x25e   : > { %v1443_v23 = vadd.f32 %v1442_v12, %v1330_v32  ;;  %v1219_v60 = vpop.f32.mrf.mxu0  ;;  %v1332_v14 = vpop.f32.mrf.mxu1 }
 0x25f   : > { %v1333_v61 = vadd.f32 %v1332_v14, %v1219_v60 }
 0x260   : > { %v1556_v18 = vadd.f32 %v1555_v45, %v1443_v23 }
 0x262   : > { %v1722_v57 = vadd.f32 %v2862_v43, %v1556_v18 }
 0x264   : > { %1754 = vst [vmem:[%s2875_s3 + $0x80] sm:$0xff] %v1722_v57 }
 0x265   : > { %v1445_v55 = vpop.f32.mrf.mxu2  ;;  %v1558_v54 = vpop.f32.mrf.mxu3 }
 0x266   : > { %v1446_v22 = vadd.f32 %v1445_v55, %v1333_v61  ;;  %v1222_v33 = vpop.f32.mrf.mxu0  ;;  %v1335_v34 = vpop.f32.mrf.mxu1 }
 0x267   : > { %v1336_v51 = vadd.f32 %v1335_v34, %v1222_v33 }
 0x268   : > { %v1559_v58 = vadd.f32 %v1558_v54, %v1446_v22 }
 0x26a   : > { %v1723_v30 = vadd.f32 %v2862_v43, %v1559_v58 }
 0x26c   : > { %1755 = vst [vmem:[%s2875_s3 + $0x88] sm:$0xff] %v1723_v30 }
 0x26d   : > { %v1448_v13 = vpop.f32.mrf.mxu2  ;;  %v1561_v35 = vpop.f32.mrf.mxu3 }
 0x26e   : > { %v1449_v36 = vadd.f32 %v1448_v13, %v1336_v51  ;;  %v1225_v39 = vpop.f32.mrf.mxu0  ;;  %v1338_v16 = vpop.f32.mrf.mxu1 }
 0x26f   : > { %v1339_v9 = vadd.f32 %v1338_v16, %v1225_v39 }
 0x270   : > { %v1562_v44 = vadd.f32 %v1561_v35, %v1449_v36 }
 0x272   : > { %v1724_v5 = vadd.f32 %v2862_v43, %v1562_v44 }
 0x274   : > { %1756 = vst [vmem:[%s2875_s3 + $0x90] sm:$0xff] %v1724_v5 }
 0x275   : > { %v1451_v19 = vpop.f32.mrf.mxu2  ;;  %v1564_v29 = vpop.f32.mrf.mxu3 }
 0x276   : > { %v1452_v56 = vadd.f32 %v1451_v19, %v1339_v9  ;;  %v1228_v63 = vpop.f32.mrf.mxu0  ;;  %v1341_v21 = vpop.f32.mrf.mxu1 }
 0x277   : > { %v1342_v7 = vadd.f32 %v1341_v21, %v1228_v63 }
 0x278   : > { %v1565_v25 = vadd.f32 %v1564_v29, %v1452_v56 }
 0x27a   : > { %v1725_v40 = vadd.f32 %v2862_v43, %v1565_v25 }
 0x27c   : > { %1757 = vst [vmem:[%s2875_s3 + $0x98] sm:$0xff] %v1725_v40 }
 0x27d   : > { %v1454_v48 = vpop.f32.mrf.mxu2  ;;  %v1567_v11 = vpop.f32.mrf.mxu3 }
 0x27e   : > { %v1455_v20 = vadd.f32 %v1454_v48, %v1342_v7  ;;  %v1231_v8 = vpop.f32.mrf.mxu0  ;;  %v1344_v24 = vpop.f32.mrf.mxu1 }
 0x27f   : > { %v1345_v2 = vadd.f32 %v1344_v24, %v1231_v8 }
 0x280   : > { %v1568_v42 = vadd.f32 %v1567_v11, %v1455_v20 }
 0x282   : > { %v1726_v46 = vadd.f32 %v2862_v43, %v1568_v42 }
 0x284   : > { %1758 = vst [vmem:[%s2875_s3 + $0xa0] sm:$0xff] %v1726_v46 }
 0x285   : > { %v1457_v50 = vpop.f32.mrf.mxu2  ;;  %v1570_v41 = vpop.f32.mrf.mxu3 }
 0x286   : > { %v1458_v62 = vadd.f32 %v1457_v50, %v1345_v2  ;;  %v1234_v3 = vpop.f32.mrf.mxu0  ;;  %v1347_v38 = vpop.f32.mrf.mxu1 }
 0x287   : > { %v1348_v26 = vadd.f32 %v1347_v38, %v1234_v3 }
 0x288   : > { %v1571_v0 = vadd.f32 %v1570_v41, %v1458_v62 }
 0x28a   : > { %v1727_v4 = vadd.f32 %v2862_v43, %v1571_v0 }
 0x28c   : > { %1759 = vst [vmem:[%s2875_s3 + $0xa8] sm:$0xff] %v1727_v4 }
 0x28d   : > { %v1460_v59 = vpop.f32.mrf.mxu2  ;;  %v1573_v47 = vpop.f32.mrf.mxu3 }
 0x28e   : > { %v1461_v1 = vadd.f32 %v1460_v59, %v1348_v26  ;;  %v1237_v37 = vpop.f32.mrf.mxu0  ;;  %v1350_v10 = vpop.f32.mrf.mxu1 }
 0x28f   : > { %v1351_v17 = vadd.f32 %v1350_v10, %v1237_v37 }
 0x290   : > { %v1574_v15 = vadd.f32 %v1573_v47, %v1461_v1 }
 0x292   : > { %v1728_v52 = vadd.f32 %v2862_v43, %v1574_v15 }
 0x294   : > { %1760 = vst [vmem:[%s2875_s3 + $0xb0] sm:$0xff] %v1728_v52 }
 0x295   : > { %v1463_v31 = vpop.f32.mrf.mxu2  ;;  %v1576_v6 = vpop.f32.mrf.mxu3 }
 0x296   : > { %v1464_v27 = vadd.f32 %v1463_v31, %v1351_v17  ;;  %v1240_v49 = vpop.f32.mrf.mxu0  ;;  %v1353_v53 = vpop.f32.mrf.mxu1 }
 0x297   : > { %v1354_v12 = vadd.f32 %v1353_v53, %v1240_v49 }
 0x298   : > { %v1577_v28 = vadd.f32 %v1576_v6, %v1464_v27 }
 0x29a   : > { %v1729_v32 = vadd.f32 %v2862_v43, %v1577_v28 }
 0x29c   : > { %1761 = vst [vmem:[%s2875_s3 + $0xb8] sm:$0xff] %v1729_v32 }
 0x29d   : > { %v1466_v45 = vpop.f32.mrf.mxu2  ;;  %v1579_v23 = vpop.f32.mrf.mxu3 }
 0x29e   : > { %v1467_v60 = vadd.f32 %v1466_v45, %v1354_v12  ;;  %v1243_v14 = vpop.f32.mrf.mxu0  ;;  %v1356_v18 = vpop.f32.mrf.mxu1 }
 0x29f   : > { %v1357_v55 = vadd.f32 %v1356_v18, %v1243_v14 }
 0x2a0   : > { %v1580_v57 = vadd.f32 %v1579_v23, %v1467_v60 }
 0x2a2   : > { %v1730_v61 = vadd.f32 %v2862_v43, %v1580_v57 }
 0x2a4   : > { %1762 = vst [vmem:[%s2875_s3 + $0xc0] sm:$0xff] %v1730_v61 }
 0x2a5   : > { %v1469_v54 = vpop.f32.mrf.mxu2  ;;  %v1582_v22 = vpop.f32.mrf.mxu3 }
 0x2a6   : > { %v1470_v33 = vadd.f32 %v1469_v54, %v1357_v55  ;;  %v1246_v34 = vpop.f32.mrf.mxu0  ;;  %v1359_v58 = vpop.f32.mrf.mxu1 }
 0x2a7   : > { %v1360_v13 = vadd.f32 %v1359_v58, %v1246_v34 }
 0x2a8   : > { %v1583_v30 = vadd.f32 %v1582_v22, %v1470_v33 }
 0x2aa   : > { %v1731_v51 = vadd.f32 %v2862_v43, %v1583_v30 }
 0x2ac   : > { %1763 = vst [vmem:[%s2875_s3 + $0xc8] sm:$0xff] %v1731_v51 }
 0x2ad   : > { %v1472_v35 = vpop.f32.mrf.mxu2  ;;  %v1585_v36 = vpop.f32.mrf.mxu3 }
 0x2ae   : > { %v1473_v39 = vadd.f32 %v1472_v35, %v1360_v13  ;;  %v1249_v16 = vpop.f32.mrf.mxu0  ;;  %v1362_v44 = vpop.f32.mrf.mxu1 }
 0x2af   : > { %v1363_v19 = vadd.f32 %v1362_v44, %v1249_v16 }
 0x2b0   : > { %v1586_v5 = vadd.f32 %v1585_v36, %v1473_v39 }
 0x2b2   : > { %v1732_v9 = vadd.f32 %v2862_v43, %v1586_v5 }
 0x2b4   : > { %1764 = vst [vmem:[%s2875_s3 + $0xd0] sm:$0xff] %v1732_v9 }
 0x2b5   : > { %v1475_v29 = vpop.f32.mrf.mxu2  ;;  %v1588_v56 = vpop.f32.mrf.mxu3 }
 0x2b6   : > { %v1476_v63 = vadd.f32 %v1475_v29, %v1363_v19  ;;  %v1252_v21 = vpop.f32.mrf.mxu0  ;;  %v1365_v25 = vpop.f32.mrf.mxu1 }
 0x2b7   : > { %v1366_v48 = vadd.f32 %v1365_v25, %v1252_v21 }
 0x2b8   : > { %v1589_v40 = vadd.f32 %v1588_v56, %v1476_v63 }
 0x2ba   : > { %v1733_v7 = vadd.f32 %v2862_v43, %v1589_v40 }
 0x2bc   : > { %1765 = vst [vmem:[%s2875_s3 + $0xd8] sm:$0xff] %v1733_v7 }
 0x2bd   : > { %v1478_v11 = vpop.f32.mrf.mxu2  ;;  %v1591_v20 = vpop.f32.mrf.mxu3 }
 0x2be   : > { %v1479_v8 = vadd.f32 %v1478_v11, %v1366_v48  ;;  %v1255_v24 = vpop.f32.mrf.mxu0  ;;  %v1368_v42 = vpop.f32.mrf.mxu1 }
 0x2bf   : > { %v1369_v50 = vadd.f32 %v1368_v42, %v1255_v24 }
 0x2c0   : > { %v1592_v46 = vadd.f32 %v1591_v20, %v1479_v8 }
 0x2c2   : > { %v1734_v2 = vadd.f32 %v2862_v43, %v1592_v46 }
 0x2c4   : > { %1766 = vst [vmem:[%s2875_s3 + $0xe0] sm:$0xff] %v1734_v2 }
 0x2c5   : > { %v1481_v41 = vpop.f32.mrf.mxu2  ;;  %v1594_v62 = vpop.f32.mrf.mxu3 }
 0x2c6   : > { %v1482_v3 = vadd.f32 %v1481_v41, %v1369_v50  ;;  %v1258_v38 = vpop.f32.mrf.mxu0  ;;  %v1371_v0 = vpop.f32.mrf.mxu1 }
 0x2c7   : > { %v1372_v59 = vadd.f32 %v1371_v0, %v1258_v38 }
 0x2c8   : > { %v1595_v4 = vadd.f32 %v1594_v62, %v1482_v3 }
 0x2ca   : > { %v1735_v26 = vadd.f32 %v2862_v43, %v1595_v4 }
 0x2cc   : > { %1767 = vst [vmem:[%s2875_s3 + $0xe8] sm:$0xff] %v1735_v26 }
 0x2cd   : > { %v1484_v47 = vpop.f32.mrf.mxu2  ;;  %v1597_v1 = vpop.f32.mrf.mxu3 }
 0x2ce   : > { %v1485_v37 = vadd.f32 %v1484_v47, %v1372_v59  ;;  %v1261_v15 = vpop.f32.mrf.mxu0  ;;  %v1374_v52 = vpop.f32.mrf.mxu1 }
 0x2cf   : > { %v1375_v31 = vadd.f32 %v1374_v52, %v1261_v15 }
 0x2d0   : > { %v1598_v10 = vadd.f32 %v1597_v1, %v1485_v37 }
 0x2d2   : > { %v1736_v17 = vadd.f32 %v2862_v43, %v1598_v10 }
 0x2d4   : > { %1768 = vst [vmem:[%s2875_s3 + $0xf0] sm:$0xff] %v1736_v17 }
 0x2d5   : > { %v1487_v6 = vpop.f32.mrf.mxu2  ;;  %v1600_v49 = vpop.f32.mrf.mxu3 }
 0x2d6   : > { %v1488_v27 = vadd.f32 %v1487_v6, %v1375_v31 }
 0x2d8   : > { %v1601_v53 = vadd.f32 %v1600_v49, %v1488_v27 }
 0x2da   : > { %v1737_v28 = vadd.f32 %v2862_v43, %v1601_v53 }
 0x2dc   : > { %1769 = vst [vmem:[%s2875_s3 + $0xf8] sm:$0xff] %v1737_v28 }
 0x2dd   : > { %2172 = shalt.err (!%p2169_p0)
}
 0x2de   : > { %s2244_s10 = smov 128   ;;  %s2245_s11 = smov 8  }
 0x2df   : > { %1939 = dma.vmem_to_hbm [thread:$0]  (%p2368_p3), %s1784_s7, 4096, %s1786_s16, %s1771_s21, %s2244_s10, %s2244_s10, %s2245_s11  }
 0x2e0 PF: > { %s1800_s1 = sand.u32 1, %s2215_s18   ;;  %p1956_p5 = pnand %p1908_p11, %p2325_p6 }
 0x2e1   : > { %s1801_s2 = scalar_lea.sflag [#allocation5], %s1800_s1 }
 0x2e2   : > { %p1957_p7 = pneg %p1956_p5 }
 0x2e4   : > { %2210 = dma.done.wait (%p1957_p7), %s1801_s2, 4096  }
 0x2e5   : > { %2212 = vsyncadd (%p1957_p7), %s1801_s2, 4294963200  ;;  %s23_s23 = sadd.s32 1, %s2235_s23   ;;  %s3165_s18 = smov %s2219_s19 }
 0x2e6   : > { %p20_p9 = scmp.ge.s32.totalorder %s23_s23, 4   ;;  %s3166_s19 = smov %s2223_s20 }
 0x2e7   : > { %s3167_s20 = smov %s2384_s27  ;;  %s3168_s21 = smov %s2231_s22 }
 0x2e8   : > { %s3169_s22 = smov %s3171_s15  ;;  %22 = sbr.rel (!%p20_p9) target bundleno = 12 (0xc), region = 108 }
 0x2ed   :  { %1807 = vsyncpa [#allocation4], 1 }
 0x2ee   :  { %1809 = vsyncpa [#allocation4 + $0x1], 1 }
 0x2ef   :  { %1810 = vsyncpa [#allocation7], 1 }
 0x2f0   :  { %1811 = vsyncpa [#allocation10], 1 }
 0x2f1   :  { %1812 = vsyncpa [#allocation5], 1 }
 0x2f2   :  { %1814 = vsyncpa [#allocation5 + $0x1], 1 }

</bundles_post_ra>
